<compile_context>
chip_gen: v6e
topology: v6e:2x2x1
jax: 0.10.0
libtpu: 0.0.40
codegen_flags: <defaults>
</compile_context>

<pallas_src>
import functools

import jax
import jax.numpy as jnp
from jax.experimental import pallas as pl

# ---- small XLM-R-like config (scaled down from xlm-roberta-base) ----
VOCAB = 100
HIDDEN = 32
HEADS = 4
HEAD_DIM = HIDDEN // HEADS
INTERMEDIATE = 64
LAYERS = 2
MAX_POS = 40
PAD_ID = 1          # XLM-R padding_idx
LN_EPS = 1e-5
_SQRT1_2 = 0.7071067811865476


# --------------------------- in-kernel helpers ---------------------------

def _layernorm(x, g, b, eps=LN_EPS):
    mu = jnp.mean(x, axis=-1, keepdims=True)
    var = jnp.mean(jnp.square(x - mu), axis=-1, keepdims=True)
    return (x - mu) * jax.lax.rsqrt(var + eps) * g + b


def _gelu(x):
    # exact (erf) GELU, as used by XLM-R
    return 0.5 * x * (1.0 + jax.lax.erf(x * _SQRT1_2))


def _matmul(x, w):
    # bf16 MXU inputs, f32 accumulation (weights are passed in already in bf16)
    return jnp.dot(x.astype(jnp.bfloat16), w, preferred_element_type=jnp.float32)


# --------------------------- fused encoder kernel ---------------------------

def _encoder_kernel(emb_ref, bias_ref, emb_g_ref, emb_b_ref,
                    qkv_w_ref, qkv_b_ref, o_w_ref, o_b_ref,
                    ln1_g_ref, ln1_b_ref,
                    i_w_ref, i_b_ref, f_w_ref, f_b_ref,
                    ln2_g_ref, ln2_b_ref,
                    pool_w_ref, pool_b_ref,
                    out_ref, *, batch, seq, heads, head_dim, layers):
    hidden = heads * head_dim
    bf16 = jnp.bfloat16

    bias = bias_ref[...]                                          # [B, 1, S] additive mask

    # ---- embedding LayerNorm ----
    x = _layernorm(emb_ref[...], emb_g_ref[...], emb_b_ref[...])  # [B*S, H] f32

    # ---- statically unrolled encoder stack (no grid => no per-layer launch) ----
    for l in range(layers):
        # fused QKV projection; 1/sqrt(head_dim) already folded into Q weights
        qkv = _matmul(x, qkv_w_ref[l]) + qkv_b_ref[l]             # [B*S, 3H] f32

        # attention: static head loop, single-batch-dim einsums per head
        attn = jnp.zeros((batch * seq, hidden), jnp.float32)
        for h in range(heads):
            lo = h * head_dim
            qh = qkv[:, lo:lo + head_dim].reshape(batch, seq, head_dim)
            kh = qkv[:, hidden + lo:hidden + lo + head_dim].reshape(batch, seq, head_dim)
            vh = qkv[:, 2 * hidden + lo:2 * hidden + lo + head_dim].reshape(batch, seq, head_dim)

            s = jnp.einsum('bqd,bkd->bqk', qh.astype(bf16), kh.astype(bf16),
                           preferred_element_type=jnp.float32)    # [B, S, S]
            s = s + bias
            m = jnp.max(s, axis=-1, keepdims=True)
            p = jnp.exp(s - m)
            p = p * pl.reciprocal(jnp.sum(p, axis=-1, keepdims=True), approx=True)
            ch = jnp.einsum('bqk,bkd->bqd', p.astype(bf16), vh.astype(bf16),
                            preferred_element_type=jnp.float32)   # [B, S, d]
            # per-head slice of the output projection:
            #   sum_h ch_h @ o_w[h] == concat_h(ch_h) @ o_w  (no lane concat)
            attn = attn + jnp.dot(ch.reshape(batch * seq, head_dim).astype(bf16),
                                  o_w_ref[l * heads + h],
                                  preferred_element_type=jnp.float32)
        attn = attn + o_b_ref[l]

        # residual + LayerNorm, FFN (GELU), residual + LayerNorm
        x1 = _layernorm(attn + x, ln1_g_ref[l], ln1_b_ref[l])
        inter = _gelu(_matmul(x1, i_w_ref[l]) + i_b_ref[l])
        ffn = _matmul(inter, f_w_ref[l]) + f_b_ref[l]
        x = _layernorm(ffn + x1, ln2_g_ref[l], ln2_b_ref[l])

    # ---- pooler: dense + tanh on the <s>/[CLS] token of each sequence ----
    cls = x.reshape(batch, seq, hidden)[:, 0, :]                  # [B, H] via reshape/index
    out_ref[...] = jnp.tanh(_matmul(cls, pool_w_ref[...]) + pool_b_ref[...])


# --------------------------- model glue ---------------------------

def forward(prepped, ids, attention_mask, token_type_ids):
    B, S = ids.shape
    H = HIDDEN

    # --- embeddings (table gathers stay in plain JAX) ---
    we = jnp.take(prepped["word_emb"], ids, axis=0)                    # [B,S,H]
    pad_mask = (ids != PAD_ID).astype(jnp.int32)
    # XLM-R position ids: cumulative count of non-pad tokens + padding_idx
    pos = jnp.cumsum(pad_mask, axis=1) * pad_mask + PAD_ID
    pe = jnp.take(prepped["pos_emb"], pos, axis=0)
    te = jnp.take(prepped["type_emb"], token_type_ids, axis=0)
    emb = (we + pe + te).astype(jnp.float32).reshape(B * S, H)

    # HF extended attention mask: (1 - mask) * large_negative, per batch
    bias = ((1.0 - attention_mask.astype(jnp.float32)) * -1e9).reshape(B, 1, S)

    kernel = functools.partial(_encoder_kernel, batch=B, seq=S,
                               heads=HEADS, head_dim=HEAD_DIM, layers=LAYERS)

    # grid=() : one invocation, everything VMEM-resident (toy sizes).
    pooled = pl.pallas_call(
        kernel,
        out_shape=jax.ShapeDtypeStruct((B, H), jnp.float32),
    )(emb, bias,
      prepped["emb_ln_g"], prepped["emb_ln_b"],
      prepped["qkv_w"], prepped["qkv_b"],
      prepped["o_w"], prepped["o_b"],
      prepped["attn_ln_g"], prepped["attn_ln_b"],
      prepped["i_w"], prepped["i_b"],
      prepped["f_w"], prepped["f_b"],
      prepped["out_ln_g"], prepped["out_ln_b"],
      prepped["pool_w"], prepped["pool_b"])

    # self.l2 = Dropout(0.3): identity at inference time.
    return pooled


def prepare_params(p):
    """One-time host-side weight prep: fold 1/sqrt(d) into Q, cast to bf16,
    split the output projection per head, reshape biases/LN params."""
    bf16 = jnp.bfloat16
    L, H, I = LAYERS, HIDDEN, INTERMEDIATE
    scale = 1.0 / float(HEAD_DIM) ** 0.5
    qkv_w = p["qkv_w"].at[:, :, :H].multiply(scale)
    qkv_b = p["qkv_b"].at[:, :H].multiply(scale)
    return {
        "word_emb": p["word_emb"], "pos_emb": p["pos_emb"], "type_emb": p["type_emb"],
        "emb_ln_g": p["emb_ln_g"].reshape(1, H),
        "emb_ln_b": p["emb_ln_b"].reshape(1, H),
        "qkv_w": qkv_w.astype(bf16),                              # (L, H, 3H)
        "qkv_b": qkv_b.reshape(L, 1, 3 * H),
        # output projection rows are ordered (head, head_dim) -> split per head
        "o_w": p["o_w"].reshape(L * HEADS, HEAD_DIM, H).astype(bf16),
        "o_b": p["o_b"].reshape(L, 1, H),
        "attn_ln_g": p["attn_ln_g"].reshape(L, 1, H),
        "attn_ln_b": p["attn_ln_b"].reshape(L, 1, H),
        "i_w": p["i_w"].astype(bf16),                             # (L, H, I)
        "i_b": p["i_b"].reshape(L, 1, I),
        "f_w": p["f_w"].astype(bf16),                             # (L, I, H)
        "f_b": p["f_b"].reshape(L, 1, H),
        "out_ln_g": p["out_ln_g"].reshape(L, 1, H),
        "out_ln_b": p["out_ln_b"].reshape(L, 1, H),
        "pool_w": p["pool_w"].astype(bf16),
        "pool_b": p["pool_b"].reshape(1, H),
    }


def init_params(key):
    def normal(k, shape, scale=0.02):
        return scale * jax.random.normal(k, shape, jnp.float32)

    keys = jax.random.split(key, 8)
    return {
        "word_emb": normal(keys[0], (VOCAB, HIDDEN)),
        "pos_emb": normal(keys[1], (MAX_POS, HIDDEN)),
        "type_emb": normal(keys[2], (1, HIDDEN)),        # XLM-R type_vocab_size = 1
        "emb_ln_g": jnp.ones((HIDDEN,), jnp.float32),
        "emb_ln_b": jnp.zeros((HIDDEN,), jnp.float32),
        "pool_w": normal(keys[3], (HIDDEN, HIDDEN)),
        "pool_b": jnp.zeros((HIDDEN,), jnp.float32),
        # per-layer weights stacked along a leading layer axis; q/k/v packed
        "qkv_w": normal(keys[4], (LAYERS, HIDDEN, 3 * HIDDEN)),
        "qkv_b": jnp.zeros((LAYERS, 3 * HIDDEN), jnp.float32),
        "o_w": normal(keys[5], (LAYERS, HIDDEN, HIDDEN)),
        "o_b": jnp.zeros((LAYERS, HIDDEN), jnp.float32),
        "attn_ln_g": jnp.ones((LAYERS, HIDDEN), jnp.float32),
        "attn_ln_b": jnp.zeros((LAYERS, HIDDEN), jnp.float32),
        "i_w": normal(keys[6], (LAYERS, HIDDEN, INTERMEDIATE)),
        "i_b": jnp.zeros((LAYERS, INTERMEDIATE), jnp.float32),
        "f_w": normal(keys[7], (LAYERS, INTERMEDIATE, HIDDEN)),
        "f_b": jnp.zeros((LAYERS, HIDDEN), jnp.float32),
        "out_ln_g": jnp.ones((LAYERS, HIDDEN), jnp.float32),
        "out_ln_b": jnp.zeros((LAYERS, HIDDEN), jnp.float32),
    }


if __name__ == "__main__":
    key = jax.random.PRNGKey(0)
    pkey, ikey = jax.random.split(key)
    params = prepare_params(init_params(pkey))   # one-time host-side weight prep

    B, S = 2, 8
    ids = jax.random.randint(ikey, (B, S), 2, VOCAB, dtype=jnp.int32)
    attention_mask = jnp.ones((B, S), jnp.int32)
    # pad the tail of the second sequence to exercise the attention mask
    ids = ids.at[1, 6:].set(PAD_ID)
    attention_mask = attention_mask.at[1, 6:].set(0)
    token_type_ids = jnp.zeros((B, S), jnp.int32)

    out = jax.jit(forward)(params, ids, attention_mask, token_type_ids)
    out = jax.block_until_ready(out)
    assert out.shape == (B, HIDDEN) and out.dtype == jnp.float32
    print("KERNEL_OK")
</pallas_src>

<mosaic_0001>
module attributes {stable_mosaic.version = 11 : i64} {
  func.func @_encoder_kernel(%arg0: memref<16x32xf32, #tpu.memory_space<vmem>>, %arg1: memref<2x1x8xf32, #tpu.memory_space<vmem>>, %arg2: memref<1x32xf32, #tpu.memory_space<vmem>>, %arg3: memref<1x32xf32, #tpu.memory_space<vmem>>, %arg4: memref<2x32x96xbf16, #tpu.memory_space<vmem>>, %arg5: memref<2x1x96xf32, #tpu.memory_space<vmem>>, %arg6: memref<8x8x32xbf16, #tpu.memory_space<vmem>>, %arg7: memref<2x1x32xf32, #tpu.memory_space<vmem>>, %arg8: memref<2x1x32xf32, #tpu.memory_space<vmem>>, %arg9: memref<2x1x32xf32, #tpu.memory_space<vmem>>, %arg10: memref<2x32x64xbf16, #tpu.memory_space<vmem>>, %arg11: memref<2x1x64xf32, #tpu.memory_space<vmem>>, %arg12: memref<2x64x32xbf16, #tpu.memory_space<vmem>>, %arg13: memref<2x1x32xf32, #tpu.memory_space<vmem>>, %arg14: memref<2x1x32xf32, #tpu.memory_space<vmem>>, %arg15: memref<2x1x32xf32, #tpu.memory_space<vmem>>, %arg16: memref<32x32xbf16, #tpu.memory_space<vmem>>, %arg17: memref<1x32xf32, #tpu.memory_space<vmem>>, %arg18: memref<2x32xf32, #tpu.memory_space<vmem>>) attributes {dimension_semantics = [], scalar_prefetch = 0 : i64, scratch_operands = 0 : i64, tpu.core_type = #tpu.core_type<tc>} {
    %c0 = arith.constant 0 : index
    %c0_0 = arith.constant 0 : index
    %c0_1 = arith.constant 0 : index
    %0 = vector.load %arg1[%c0, %c0_0, %c0_1] : memref<2x1x8xf32, #tpu.memory_space<vmem>>, vector<2x1x8xf32>
    %c0_2 = arith.constant 0 : index
    %c0_3 = arith.constant 0 : index
    %1 = vector.load %arg0[%c0_2, %c0_3] : memref<16x32xf32, #tpu.memory_space<vmem>>, vector<16x32xf32>
    %c0_4 = arith.constant 0 : index
    %c0_5 = arith.constant 0 : index
    %2 = vector.load %arg2[%c0_4, %c0_5] : memref<1x32xf32, #tpu.memory_space<vmem>>, vector<1x32xf32>
    %c0_6 = arith.constant 0 : index
    %c0_7 = arith.constant 0 : index
    %3 = vector.load %arg3[%c0_6, %c0_7] : memref<1x32xf32, #tpu.memory_space<vmem>>, vector<1x32xf32>
    %cst = arith.constant dense<0.000000e+00> : vector<16xf32>
    %4 = vector.multi_reduction <add>, %1, %cst [1] : vector<16x32xf32> to vector<16xf32>
    %5 = vector.shape_cast %4 : vector<16xf32> to vector<16x1xf32>
    %cst_8 = arith.constant 3.200000e+01 : f32
    %6 = vector.broadcast %cst_8 : f32 to vector<16x1xf32>
    %7 = arith.divf %5, %6 : vector<16x1xf32>
    %8 = vector.broadcast %7 : vector<16x1xf32> to vector<16x32xf32>
    %9 = arith.subf %1, %8 : vector<16x32xf32>
    %10 = arith.mulf %9, %9 : vector<16x32xf32>
    %cst_9 = arith.constant dense<0.000000e+00> : vector<16xf32>
    %11 = vector.multi_reduction <add>, %10, %cst_9 [1] : vector<16x32xf32> to vector<16xf32>
    %12 = vector.shape_cast %11 : vector<16xf32> to vector<16x1xf32>
    %cst_10 = arith.constant 3.200000e+01 : f32
    %13 = vector.broadcast %cst_10 : f32 to vector<16x1xf32>
    %14 = arith.divf %12, %13 : vector<16x1xf32>
    %15 = vector.broadcast %7 : vector<16x1xf32> to vector<16x32xf32>
    %16 = arith.subf %1, %15 : vector<16x32xf32>
    %cst_11 = arith.constant 9.99999974E-6 : f32
    %17 = vector.broadcast %cst_11 : f32 to vector<16x1xf32>
    %18 = arith.addf %14, %17 : vector<16x1xf32>
    %19 = math.rsqrt %18 : vector<16x1xf32>
    %20 = vector.broadcast %19 : vector<16x1xf32> to vector<16x32xf32>
    %21 = arith.mulf %16, %20 : vector<16x32xf32>
    %22 = vector.broadcast %2 : vector<1x32xf32> to vector<16x32xf32>
    %23 = arith.mulf %21, %22 : vector<16x32xf32>
    %24 = vector.broadcast %3 : vector<1x32xf32> to vector<16x32xf32>
    %25 = arith.addf %23, %24 : vector<16x32xf32>
    %c0_12 = arith.constant 0 : index
    %c0_13 = arith.constant 0 : index
    %c0_14 = arith.constant 0 : index
    %26 = vector.load %arg4[%c0_12, %c0_13, %c0_14] : memref<2x32x96xbf16, #tpu.memory_space<vmem>>, vector<1x32x96xbf16>
    %27 = vector.shape_cast %26 : vector<1x32x96xbf16> to vector<32x96xbf16>
    %28 = arith.truncf %25 : vector<16x32xf32> to vector<16x32xbf16>
    %cst_15 = arith.constant dense<0.000000e+00> : vector<16x96xf32>
    %29 = tpu.matmul %28, %27, %cst_15 {dimension_numbers = #tpu.dot_dimension_numbers<[1], [0], [0], [1], [0, 0, 1, 1], [], []>} : vector<16x32xbf16>, vector<32x96xbf16>, vector<16x96xf32> -> vector<16x96xf32>
    %c0_16 = arith.constant 0 : index
    %c0_17 = arith.constant 0 : index
    %c0_18 = arith.constant 0 : index
    %30 = vector.load %arg5[%c0_16, %c0_17, %c0_18] : memref<2x1x96xf32, #tpu.memory_space<vmem>>, vector<1x1x96xf32>
    %31 = vector.shape_cast %30 : vector<1x1x96xf32> to vector<1x96xf32>
    %32 = vector.broadcast %31 : vector<1x96xf32> to vector<16x96xf32>
    %33 = arith.addf %29, %32 : vector<16x96xf32>
    %cst_19 = arith.constant 0.000000e+00 : f32
    %34 = vector.broadcast %cst_19 : f32 to vector<16x32xf32>
    %35 = vector.extract_strided_slice %33 {offsets = [0, 0], sizes = [16, 8], strides = [1, 1]} : vector<16x96xf32> to vector<16x8xf32>
    %36 = vector.shape_cast %35 : vector<16x8xf32> to vector<2x8x8xf32>
    %37 = vector.extract_strided_slice %33 {offsets = [0, 32], sizes = [16, 8], strides = [1, 1]} : vector<16x96xf32> to vector<16x8xf32>
    %38 = vector.shape_cast %37 : vector<16x8xf32> to vector<2x8x8xf32>
    %39 = vector.extract_strided_slice %33 {offsets = [0, 64], sizes = [16, 8], strides = [1, 1]} : vector<16x96xf32> to vector<16x8xf32>
    %40 = vector.shape_cast %39 : vector<16x8xf32> to vector<2x8x8xf32>
    %41 = arith.truncf %36 : vector<2x8x8xf32> to vector<2x8x8xbf16>
    %42 = arith.truncf %38 : vector<2x8x8xf32> to vector<2x8x8xbf16>
    "tpu.trace_start"() <{level = 10 : i32, message = "bqd,bkd->bqk"}> : () -> ()
    %cst_20 = arith.constant dense<0.000000e+00> : vector<2x8x8xf32>
    %43 = tpu.matmul %41, %42, %cst_20 {dimension_numbers = #tpu.dot_dimension_numbers<[2], [2], [1], [1], [0, 0, 0, 1, 1, 1], [0], [0]>} : vector<2x8x8xbf16>, vector<2x8x8xbf16>, vector<2x8x8xf32> -> vector<2x8x8xf32>
    "tpu.trace_stop"() : () -> ()
    %44 = vector.broadcast %0 : vector<2x1x8xf32> to vector<2x8x8xf32>
    %45 = arith.addf %43, %44 : vector<2x8x8xf32>
    %cst_21 = arith.constant dense<0xFF800000> : vector<2x8xf32>
    %46 = vector.multi_reduction <maximumf>, %45, %cst_21 [2] : vector<2x8x8xf32> to vector<2x8xf32>
    %47 = vector.shape_cast %46 : vector<2x8xf32> to vector<2x8x1xf32>
    %48 = vector.broadcast %47 : vector<2x8x1xf32> to vector<2x8x8xf32>
    %49 = arith.subf %45, %48 : vector<2x8x8xf32>
    %50 = math.exp %49 : vector<2x8x8xf32>
    %cst_22 = arith.constant dense<0.000000e+00> : vector<2x8xf32>
    %51 = vector.multi_reduction <add>, %50, %cst_22 [2] : vector<2x8x8xf32> to vector<2x8xf32>
    %52 = vector.shape_cast %51 : vector<2x8xf32> to vector<2x8x1xf32>
    %53 = tpu.reciprocal %52 {approx = true} : vector<2x8x1xf32> -> vector<2x8x1xf32>
    %54 = vector.broadcast %53 : vector<2x8x1xf32> to vector<2x8x8xf32>
    %55 = arith.mulf %50, %54 : vector<2x8x8xf32>
    %56 = arith.truncf %55 : vector<2x8x8xf32> to vector<2x8x8xbf16>
    %57 = arith.truncf %40 : vector<2x8x8xf32> to vector<2x8x8xbf16>
    "tpu.trace_start"() <{level = 10 : i32, message = "bqk,bkd->bqd"}> : () -> ()
    %cst_23 = arith.constant dense<0.000000e+00> : vector<2x8x8xf32>
    %58 = tpu.matmul %56, %57, %cst_23 {dimension_numbers = #tpu.dot_dimension_numbers<[2], [1], [1], [2], [0, 0, 0, 1, 1, 2], [0], [0]>} : vector<2x8x8xbf16>, vector<2x8x8xbf16>, vector<2x8x8xf32> -> vector<2x8x8xf32>
    "tpu.trace_stop"() : () -> ()
    %59 = vector.shape_cast %58 : vector<2x8x8xf32> to vector<16x8xf32>
    %60 = arith.truncf %59 : vector<16x8xf32> to vector<16x8xbf16>
    %c0_24 = arith.constant 0 : index
    %c0_25 = arith.constant 0 : index
    %c0_26 = arith.constant 0 : index
    %61 = vector.load %arg6[%c0_24, %c0_25, %c0_26] : memref<8x8x32xbf16, #tpu.memory_space<vmem>>, vector<1x8x32xbf16>
    %62 = vector.shape_cast %61 : vector<1x8x32xbf16> to vector<8x32xbf16>
    %cst_27 = arith.constant dense<0.000000e+00> : vector<16x32xf32>
    %63 = tpu.matmul %60, %62, %cst_27 {dimension_numbers = #tpu.dot_dimension_numbers<[1], [0], [0], [1], [0, 0, 1, 1], [], []>} : vector<16x8xbf16>, vector<8x32xbf16>, vector<16x32xf32> -> vector<16x32xf32>
    %64 = arith.addf %34, %63 : vector<16x32xf32>
    %65 = vector.extract_strided_slice %33 {offsets = [0, 8], sizes = [16, 8], strides = [1, 1]} : vector<16x96xf32> to vector<16x8xf32>
    %66 = vector.shape_cast %65 : vector<16x8xf32> to vector<2x8x8xf32>
    %67 = vector.extract_strided_slice %33 {offsets = [0, 40], sizes = [16, 8], strides = [1, 1]} : vector<16x96xf32> to vector<16x8xf32>
    %68 = vector.shape_cast %67 : vector<16x8xf32> to vector<2x8x8xf32>
    %69 = vector.extract_strided_slice %33 {offsets = [0, 72], sizes = [16, 8], strides = [1, 1]} : vector<16x96xf32> to vector<16x8xf32>
    %70 = vector.shape_cast %69 : vector<16x8xf32> to vector<2x8x8xf32>
    %71 = arith.truncf %66 : vector<2x8x8xf32> to vector<2x8x8xbf16>
    %72 = arith.truncf %68 : vector<2x8x8xf32> to vector<2x8x8xbf16>
    "tpu.trace_start"() <{level = 10 : i32, message = "bqd,bkd->bqk"}> : () -> ()
    %cst_28 = arith.constant dense<0.000000e+00> : vector<2x8x8xf32>
    %73 = tpu.matmul %71, %72, %cst_28 {dimension_numbers = #tpu.dot_dimension_numbers<[2], [2], [1], [1], [0, 0, 0, 1, 1, 1], [0], [0]>} : vector<2x8x8xbf16>, vector<2x8x8xbf16>, vector<2x8x8xf32> -> vector<2x8x8xf32>
    "tpu.trace_stop"() : () -> ()
    %74 = vector.broadcast %0 : vector<2x1x8xf32> to vector<2x8x8xf32>
    %75 = arith.addf %73, %74 : vector<2x8x8xf32>
    %cst_29 = arith.constant dense<0xFF800000> : vector<2x8xf32>
    %76 = vector.multi_reduction <maximumf>, %75, %cst_29 [2] : vector<2x8x8xf32> to vector<2x8xf32>
    %77 = vector.shape_cast %76 : vector<2x8xf32> to vector<2x8x1xf32>
    %78 = vector.broadcast %77 : vector<2x8x1xf32> to vector<2x8x8xf32>
    %79 = arith.subf %75, %78 : vector<2x8x8xf32>
    %80 = math.exp %79 : vector<2x8x8xf32>
    %cst_30 = arith.constant dense<0.000000e+00> : vector<2x8xf32>
    %81 = vector.multi_reduction <add>, %80, %cst_30 [2] : vector<2x8x8xf32> to vector<2x8xf32>
    %82 = vector.shape_cast %81 : vector<2x8xf32> to vector<2x8x1xf32>
    %83 = tpu.reciprocal %82 {approx = true} : vector<2x8x1xf32> -> vector<2x8x1xf32>
    %84 = vector.broadcast %83 : vector<2x8x1xf32> to vector<2x8x8xf32>
    %85 = arith.mulf %80, %84 : vector<2x8x8xf32>
    %86 = arith.truncf %85 : vector<2x8x8xf32> to vector<2x8x8xbf16>
    %87 = arith.truncf %70 : vector<2x8x8xf32> to vector<2x8x8xbf16>
    "tpu.trace_start"() <{level = 10 : i32, message = "bqk,bkd->bqd"}> : () -> ()
    %cst_31 = arith.constant dense<0.000000e+00> : vector<2x8x8xf32>
    %88 = tpu.matmul %86, %87, %cst_31 {dimension_numbers = #tpu.dot_dimension_numbers<[2], [1], [1], [2], [0, 0, 0, 1, 1, 2], [0], [0]>} : vector<2x8x8xbf16>, vector<2x8x8xbf16>, vector<2x8x8xf32> -> vector<2x8x8xf32>
    "tpu.trace_stop"() : () -> ()
    %89 = vector.shape_cast %88 : vector<2x8x8xf32> to vector<16x8xf32>
    %90 = arith.truncf %89 : vector<16x8xf32> to vector<16x8xbf16>
    %c1 = arith.constant 1 : index
    %c0_32 = arith.constant 0 : index
    %c0_33 = arith.constant 0 : index
    %91 = vector.load %arg6[%c1, %c0_32, %c0_33] : memref<8x8x32xbf16, #tpu.memory_space<vmem>>, vector<1x8x32xbf16>
    %92 = vector.shape_cast %91 : vector<1x8x32xbf16> to vector<8x32xbf16>
    %cst_34 = arith.constant dense<0.000000e+00> : vector<16x32xf32>
    %93 = tpu.matmul %90, %92, %cst_34 {dimension_numbers = #tpu.dot_dimension_numbers<[1], [0], [0], [1], [0, 0, 1, 1], [], []>} : vector<16x8xbf16>, vector<8x32xbf16>, vector<16x32xf32> -> vector<16x32xf32>
    %94 = arith.addf %64, %93 : vector<16x32xf32>
    %95 = vector.extract_strided_slice %33 {offsets = [0, 16], sizes = [16, 8], strides = [1, 1]} : vector<16x96xf32> to vector<16x8xf32>
    %96 = vector.shape_cast %95 : vector<16x8xf32> to vector<2x8x8xf32>
    %97 = vector.extract_strided_slice %33 {offsets = [0, 48], sizes = [16, 8], strides = [1, 1]} : vector<16x96xf32> to vector<16x8xf32>
    %98 = vector.shape_cast %97 : vector<16x8xf32> to vector<2x8x8xf32>
    %99 = vector.extract_strided_slice %33 {offsets = [0, 80], sizes = [16, 8], strides = [1, 1]} : vector<16x96xf32> to vector<16x8xf32>
    %100 = vector.shape_cast %99 : vector<16x8xf32> to vector<2x8x8xf32>
    %101 = arith.truncf %96 : vector<2x8x8xf32> to vector<2x8x8xbf16>
    %102 = arith.truncf %98 : vector<2x8x8xf32> to vector<2x8x8xbf16>
    "tpu.trace_start"() <{level = 10 : i32, message = "bqd,bkd->bqk"}> : () -> ()
    %cst_35 = arith.constant dense<0.000000e+00> : vector<2x8x8xf32>
    %103 = tpu.matmul %101, %102, %cst_35 {dimension_numbers = #tpu.dot_dimension_numbers<[2], [2], [1], [1], [0, 0, 0, 1, 1, 1], [0], [0]>} : vector<2x8x8xbf16>, vector<2x8x8xbf16>, vector<2x8x8xf32> -> vector<2x8x8xf32>
    "tpu.trace_stop"() : () -> ()
    %104 = vector.broadcast %0 : vector<2x1x8xf32> to vector<2x8x8xf32>
    %105 = arith.addf %103, %104 : vector<2x8x8xf32>
    %cst_36 = arith.constant dense<0xFF800000> : vector<2x8xf32>
    %106 = vector.multi_reduction <maximumf>, %105, %cst_36 [2] : vector<2x8x8xf32> to vector<2x8xf32>
    %107 = vector.shape_cast %106 : vector<2x8xf32> to vector<2x8x1xf32>
    %108 = vector.broadcast %107 : vector<2x8x1xf32> to vector<2x8x8xf32>
    %109 = arith.subf %105, %108 : vector<2x8x8xf32>
    %110 = math.exp %109 : vector<2x8x8xf32>
    %cst_37 = arith.constant dense<0.000000e+00> : vector<2x8xf32>
    %111 = vector.multi_reduction <add>, %110, %cst_37 [2] : vector<2x8x8xf32> to vector<2x8xf32>
    %112 = vector.shape_cast %111 : vector<2x8xf32> to vector<2x8x1xf32>
    %113 = tpu.reciprocal %112 {approx = true} : vector<2x8x1xf32> -> vector<2x8x1xf32>
    %114 = vector.broadcast %113 : vector<2x8x1xf32> to vector<2x8x8xf32>
    %115 = arith.mulf %110, %114 : vector<2x8x8xf32>
    %116 = arith.truncf %115 : vector<2x8x8xf32> to vector<2x8x8xbf16>
    %117 = arith.truncf %100 : vector<2x8x8xf32> to vector<2x8x8xbf16>
    "tpu.trace_start"() <{level = 10 : i32, message = "bqk,bkd->bqd"}> : () -> ()
    %cst_38 = arith.constant dense<0.000000e+00> : vector<2x8x8xf32>
    %118 = tpu.matmul %116, %117, %cst_38 {dimension_numbers = #tpu.dot_dimension_numbers<[2], [1], [1], [2], [0, 0, 0, 1, 1, 2], [0], [0]>} : vector<2x8x8xbf16>, vector<2x8x8xbf16>, vector<2x8x8xf32> -> vector<2x8x8xf32>
    "tpu.trace_stop"() : () -> ()
    %119 = vector.shape_cast %118 : vector<2x8x8xf32> to vector<16x8xf32>
    %120 = arith.truncf %119 : vector<16x8xf32> to vector<16x8xbf16>
    %c2 = arith.constant 2 : index
    %c0_39 = arith.constant 0 : index
    %c0_40 = arith.constant 0 : index
    %121 = vector.load %arg6[%c2, %c0_39, %c0_40] : memref<8x8x32xbf16, #tpu.memory_space<vmem>>, vector<1x8x32xbf16>
    %122 = vector.shape_cast %121 : vector<1x8x32xbf16> to vector<8x32xbf16>
    %cst_41 = arith.constant dense<0.000000e+00> : vector<16x32xf32>
    %123 = tpu.matmul %120, %122, %cst_41 {dimension_numbers = #tpu.dot_dimension_numbers<[1], [0], [0], [1], [0, 0, 1, 1], [], []>} : vector<16x8xbf16>, vector<8x32xbf16>, vector<16x32xf32> -> vector<16x32xf32>
    %124 = arith.addf %94, %123 : vector<16x32xf32>
    %125 = vector.extract_strided_slice %33 {offsets = [0, 24], sizes = [16, 8], strides = [1, 1]} : vector<16x96xf32> to vector<16x8xf32>
    %126 = vector.shape_cast %125 : vector<16x8xf32> to vector<2x8x8xf32>
    %127 = vector.extract_strided_slice %33 {offsets = [0, 56], sizes = [16, 8], strides = [1, 1]} : vector<16x96xf32> to vector<16x8xf32>
    %128 = vector.shape_cast %127 : vector<16x8xf32> to vector<2x8x8xf32>
    %129 = vector.extract_strided_slice %33 {offsets = [0, 88], sizes = [16, 8], strides = [1, 1]} : vector<16x96xf32> to vector<16x8xf32>
    %130 = vector.shape_cast %129 : vector<16x8xf32> to vector<2x8x8xf32>
    %131 = arith.truncf %126 : vector<2x8x8xf32> to vector<2x8x8xbf16>
    %132 = arith.truncf %128 : vector<2x8x8xf32> to vector<2x8x8xbf16>
    "tpu.trace_start"() <{level = 10 : i32, message = "bqd,bkd->bqk"}> : () -> ()
    %cst_42 = arith.constant dense<0.000000e+00> : vector<2x8x8xf32>
    %133 = tpu.matmul %131, %132, %cst_42 {dimension_numbers = #tpu.dot_dimension_numbers<[2], [2], [1], [1], [0, 0, 0, 1, 1, 1], [0], [0]>} : vector<2x8x8xbf16>, vector<2x8x8xbf16>, vector<2x8x8xf32> -> vector<2x8x8xf32>
    "tpu.trace_stop"() : () -> ()
    %134 = vector.broadcast %0 : vector<2x1x8xf32> to vector<2x8x8xf32>
    %135 = arith.addf %133, %134 : vector<2x8x8xf32>
    %cst_43 = arith.constant dense<0xFF800000> : vector<2x8xf32>
    %136 = vector.multi_reduction <maximumf>, %135, %cst_43 [2] : vector<2x8x8xf32> to vector<2x8xf32>
    %137 = vector.shape_cast %136 : vector<2x8xf32> to vector<2x8x1xf32>
    %138 = vector.broadcast %137 : vector<2x8x1xf32> to vector<2x8x8xf32>
    %139 = arith.subf %135, %138 : vector<2x8x8xf32>
    %140 = math.exp %139 : vector<2x8x8xf32>
    %cst_44 = arith.constant dense<0.000000e+00> : vector<2x8xf32>
    %141 = vector.multi_reduction <add>, %140, %cst_44 [2] : vector<2x8x8xf32> to vector<2x8xf32>
    %142 = vector.shape_cast %141 : vector<2x8xf32> to vector<2x8x1xf32>
    %143 = tpu.reciprocal %142 {approx = true} : vector<2x8x1xf32> -> vector<2x8x1xf32>
    %144 = vector.broadcast %143 : vector<2x8x1xf32> to vector<2x8x8xf32>
    %145 = arith.mulf %140, %144 : vector<2x8x8xf32>
    %146 = arith.truncf %145 : vector<2x8x8xf32> to vector<2x8x8xbf16>
    %147 = arith.truncf %130 : vector<2x8x8xf32> to vector<2x8x8xbf16>
    "tpu.trace_start"() <{level = 10 : i32, message = "bqk,bkd->bqd"}> : () -> ()
    %cst_45 = arith.constant dense<0.000000e+00> : vector<2x8x8xf32>
    %148 = tpu.matmul %146, %147, %cst_45 {dimension_numbers = #tpu.dot_dimension_numbers<[2], [1], [1], [2], [0, 0, 0, 1, 1, 2], [0], [0]>} : vector<2x8x8xbf16>, vector<2x8x8xbf16>, vector<2x8x8xf32> -> vector<2x8x8xf32>
    "tpu.trace_stop"() : () -> ()
    %149 = vector.shape_cast %148 : vector<2x8x8xf32> to vector<16x8xf32>
    %150 = arith.truncf %149 : vector<16x8xf32> to vector<16x8xbf16>
    %c3 = arith.constant 3 : index
    %c0_46 = arith.constant 0 : index
    %c0_47 = arith.constant 0 : index
    %151 = vector.load %arg6[%c3, %c0_46, %c0_47] : memref<8x8x32xbf16, #tpu.memory_space<vmem>>, vector<1x8x32xbf16>
    %152 = vector.shape_cast %151 : vector<1x8x32xbf16> to vector<8x32xbf16>
    %cst_48 = arith.constant dense<0.000000e+00> : vector<16x32xf32>
    %153 = tpu.matmul %150, %152, %cst_48 {dimension_numbers = #tpu.dot_dimension_numbers<[1], [0], [0], [1], [0, 0, 1, 1], [], []>} : vector<16x8xbf16>, vector<8x32xbf16>, vector<16x32xf32> -> vector<16x32xf32>
    %154 = arith.addf %124, %153 : vector<16x32xf32>
    %c0_49 = arith.constant 0 : index
    %c0_50 = arith.constant 0 : index
    %c0_51 = arith.constant 0 : index
    %155 = vector.load %arg7[%c0_49, %c0_50, %c0_51] : memref<2x1x32xf32, #tpu.memory_space<vmem>>, vector<1x1x32xf32>
    %156 = vector.shape_cast %155 : vector<1x1x32xf32> to vector<1x32xf32>
    %157 = vector.broadcast %156 : vector<1x32xf32> to vector<16x32xf32>
    %158 = arith.addf %154, %157 : vector<16x32xf32>
    %159 = arith.addf %158, %25 : vector<16x32xf32>
    %c0_52 = arith.constant 0 : index
    %c0_53 = arith.constant 0 : index
    %c0_54 = arith.constant 0 : index
    %160 = vector.load %arg8[%c0_52, %c0_53, %c0_54] : memref<2x1x32xf32, #tpu.memory_space<vmem>>, vector<1x1x32xf32>
    %161 = vector.shape_cast %160 : vector<1x1x32xf32> to vector<1x32xf32>
    %c0_55 = arith.constant 0 : index
    %c0_56 = arith.constant 0 : index
    %c0_57 = arith.constant 0 : index
    %162 = vector.load %arg9[%c0_55, %c0_56, %c0_57] : memref<2x1x32xf32, #tpu.memory_space<vmem>>, vector<1x1x32xf32>
    %163 = vector.shape_cast %162 : vector<1x1x32xf32> to vector<1x32xf32>
    %cst_58 = arith.constant dense<0.000000e+00> : vector<16xf32>
    %164 = vector.multi_reduction <add>, %159, %cst_58 [1] : vector<16x32xf32> to vector<16xf32>
    %165 = vector.shape_cast %164 : vector<16xf32> to vector<16x1xf32>
    %cst_59 = arith.constant 3.200000e+01 : f32
    %166 = vector.broadcast %cst_59 : f32 to vector<16x1xf32>
    %167 = arith.divf %165, %166 : vector<16x1xf32>
    %168 = vector.broadcast %167 : vector<16x1xf32> to vector<16x32xf32>
    %169 = arith.subf %159, %168 : vector<16x32xf32>
    %170 = arith.mulf %169, %169 : vector<16x32xf32>
    %cst_60 = arith.constant dense<0.000000e+00> : vector<16xf32>
    %171 = vector.multi_reduction <add>, %170, %cst_60 [1] : vector<16x32xf32> to vector<16xf32>
    %172 = vector.shape_cast %171 : vector<16xf32> to vector<16x1xf32>
    %cst_61 = arith.constant 3.200000e+01 : f32
    %173 = vector.broadcast %cst_61 : f32 to vector<16x1xf32>
    %174 = arith.divf %172, %173 : vector<16x1xf32>
    %175 = vector.broadcast %167 : vector<16x1xf32> to vector<16x32xf32>
    %176 = arith.subf %159, %175 : vector<16x32xf32>
    %cst_62 = arith.constant 9.99999974E-6 : f32
    %177 = vector.broadcast %cst_62 : f32 to vector<16x1xf32>
    %178 = arith.addf %174, %177 : vector<16x1xf32>
    %179 = math.rsqrt %178 : vector<16x1xf32>
    %180 = vector.broadcast %179 : vector<16x1xf32> to vector<16x32xf32>
    %181 = arith.mulf %176, %180 : vector<16x32xf32>
    %182 = vector.broadcast %161 : vector<1x32xf32> to vector<16x32xf32>
    %183 = arith.mulf %181, %182 : vector<16x32xf32>
    %184 = vector.broadcast %163 : vector<1x32xf32> to vector<16x32xf32>
    %185 = arith.addf %183, %184 : vector<16x32xf32>
    %c0_63 = arith.constant 0 : index
    %c0_64 = arith.constant 0 : index
    %c0_65 = arith.constant 0 : index
    %186 = vector.load %arg10[%c0_63, %c0_64, %c0_65] : memref<2x32x64xbf16, #tpu.memory_space<vmem>>, vector<1x32x64xbf16>
    %187 = vector.shape_cast %186 : vector<1x32x64xbf16> to vector<32x64xbf16>
    %188 = arith.truncf %185 : vector<16x32xf32> to vector<16x32xbf16>
    %cst_66 = arith.constant dense<0.000000e+00> : vector<16x64xf32>
    %189 = tpu.matmul %188, %187, %cst_66 {dimension_numbers = #tpu.dot_dimension_numbers<[1], [0], [0], [1], [0, 0, 1, 1], [], []>} : vector<16x32xbf16>, vector<32x64xbf16>, vector<16x64xf32> -> vector<16x64xf32>
    %c0_67 = arith.constant 0 : index
    %c0_68 = arith.constant 0 : index
    %c0_69 = arith.constant 0 : index
    %190 = vector.load %arg11[%c0_67, %c0_68, %c0_69] : memref<2x1x64xf32, #tpu.memory_space<vmem>>, vector<1x1x64xf32>
    %191 = vector.shape_cast %190 : vector<1x1x64xf32> to vector<1x64xf32>
    %192 = vector.broadcast %191 : vector<1x64xf32> to vector<16x64xf32>
    %193 = arith.addf %189, %192 : vector<16x64xf32>
    %cst_70 = arith.constant 5.000000e-01 : f32
    %194 = vector.broadcast %cst_70 : f32 to vector<16x64xf32>
    %195 = arith.mulf %194, %193 : vector<16x64xf32>
    %cst_71 = arith.constant 0.707106769 : f32
    %196 = vector.broadcast %cst_71 : f32 to vector<16x64xf32>
    %197 = arith.mulf %193, %196 : vector<16x64xf32>
    %198 = math.erf %197 : vector<16x64xf32>
    %cst_72 = arith.constant 1.000000e+00 : f32
    %199 = vector.broadcast %cst_72 : f32 to vector<16x64xf32>
    %200 = arith.addf %199, %198 : vector<16x64xf32>
    %201 = arith.mulf %195, %200 : vector<16x64xf32>
    %c0_73 = arith.constant 0 : index
    %c0_74 = arith.constant 0 : index
    %c0_75 = arith.constant 0 : index
    %202 = vector.load %arg12[%c0_73, %c0_74, %c0_75] : memref<2x64x32xbf16, #tpu.memory_space<vmem>>, vector<1x64x32xbf16>
    %203 = vector.shape_cast %202 : vector<1x64x32xbf16> to vector<64x32xbf16>
    %204 = arith.truncf %201 : vector<16x64xf32> to vector<16x64xbf16>
    %cst_76 = arith.constant dense<0.000000e+00> : vector<16x32xf32>
    %205 = tpu.matmul %204, %203, %cst_76 {dimension_numbers = #tpu.dot_dimension_numbers<[1], [0], [0], [1], [0, 0, 1, 1], [], []>} : vector<16x64xbf16>, vector<64x32xbf16>, vector<16x32xf32> -> vector<16x32xf32>
    %c0_77 = arith.constant 0 : index
    %c0_78 = arith.constant 0 : index
    %c0_79 = arith.constant 0 : index
    %206 = vector.load %arg13[%c0_77, %c0_78, %c0_79] : memref<2x1x32xf32, #tpu.memory_space<vmem>>, vector<1x1x32xf32>
    %207 = vector.shape_cast %206 : vector<1x1x32xf32> to vector<1x32xf32>
    %208 = vector.broadcast %207 : vector<1x32xf32> to vector<16x32xf32>
    %209 = arith.addf %205, %208 : vector<16x32xf32>
    %210 = arith.addf %209, %185 : vector<16x32xf32>
    %c0_80 = arith.constant 0 : index
    %c0_81 = arith.constant 0 : index
    %c0_82 = arith.constant 0 : index
    %211 = vector.load %arg14[%c0_80, %c0_81, %c0_82] : memref<2x1x32xf32, #tpu.memory_space<vmem>>, vector<1x1x32xf32>
    %212 = vector.shape_cast %211 : vector<1x1x32xf32> to vector<1x32xf32>
    %c0_83 = arith.constant 0 : index
    %c0_84 = arith.constant 0 : index
    %c0_85 = arith.constant 0 : index
    %213 = vector.load %arg15[%c0_83, %c0_84, %c0_85] : memref<2x1x32xf32, #tpu.memory_space<vmem>>, vector<1x1x32xf32>
    %214 = vector.shape_cast %213 : vector<1x1x32xf32> to vector<1x32xf32>
    %cst_86 = arith.constant dense<0.000000e+00> : vector<16xf32>
    %215 = vector.multi_reduction <add>, %210, %cst_86 [1] : vector<16x32xf32> to vector<16xf32>
    %216 = vector.shape_cast %215 : vector<16xf32> to vector<16x1xf32>
    %cst_87 = arith.constant 3.200000e+01 : f32
    %217 = vector.broadcast %cst_87 : f32 to vector<16x1xf32>
    %218 = arith.divf %216, %217 : vector<16x1xf32>
    %219 = vector.broadcast %218 : vector<16x1xf32> to vector<16x32xf32>
    %220 = arith.subf %210, %219 : vector<16x32xf32>
    %221 = arith.mulf %220, %220 : vector<16x32xf32>
    %cst_88 = arith.constant dense<0.000000e+00> : vector<16xf32>
    %222 = vector.multi_reduction <add>, %221, %cst_88 [1] : vector<16x32xf32> to vector<16xf32>
    %223 = vector.shape_cast %222 : vector<16xf32> to vector<16x1xf32>
    %cst_89 = arith.constant 3.200000e+01 : f32
    %224 = vector.broadcast %cst_89 : f32 to vector<16x1xf32>
    %225 = arith.divf %223, %224 : vector<16x1xf32>
    %226 = vector.broadcast %218 : vector<16x1xf32> to vector<16x32xf32>
    %227 = arith.subf %210, %226 : vector<16x32xf32>
    %cst_90 = arith.constant 9.99999974E-6 : f32
    %228 = vector.broadcast %cst_90 : f32 to vector<16x1xf32>
    %229 = arith.addf %225, %228 : vector<16x1xf32>
    %230 = math.rsqrt %229 : vector<16x1xf32>
    %231 = vector.broadcast %230 : vector<16x1xf32> to vector<16x32xf32>
    %232 = arith.mulf %227, %231 : vector<16x32xf32>
    %233 = vector.broadcast %212 : vector<1x32xf32> to vector<16x32xf32>
    %234 = arith.mulf %232, %233 : vector<16x32xf32>
    %235 = vector.broadcast %214 : vector<1x32xf32> to vector<16x32xf32>
    %236 = arith.addf %234, %235 : vector<16x32xf32>
    %c1_91 = arith.constant 1 : index
    %c0_92 = arith.constant 0 : index
    %c0_93 = arith.constant 0 : index
    %237 = vector.load %arg4[%c1_91, %c0_92, %c0_93] : memref<2x32x96xbf16, #tpu.memory_space<vmem>>, vector<1x32x96xbf16>
    %238 = vector.shape_cast %237 : vector<1x32x96xbf16> to vector<32x96xbf16>
    %239 = arith.truncf %236 : vector<16x32xf32> to vector<16x32xbf16>
    %cst_94 = arith.constant dense<0.000000e+00> : vector<16x96xf32>
    %240 = tpu.matmul %239, %238, %cst_94 {dimension_numbers = #tpu.dot_dimension_numbers<[1], [0], [0], [1], [0, 0, 1, 1], [], []>} : vector<16x32xbf16>, vector<32x96xbf16>, vector<16x96xf32> -> vector<16x96xf32>
    %c1_95 = arith.constant 1 : index
    %c0_96 = arith.constant 0 : index
    %c0_97 = arith.constant 0 : index
    %241 = vector.load %arg5[%c1_95, %c0_96, %c0_97] : memref<2x1x96xf32, #tpu.memory_space<vmem>>, vector<1x1x96xf32>
    %242 = vector.shape_cast %241 : vector<1x1x96xf32> to vector<1x96xf32>
    %243 = vector.broadcast %242 : vector<1x96xf32> to vector<16x96xf32>
    %244 = arith.addf %240, %243 : vector<16x96xf32>
    %cst_98 = arith.constant 0.000000e+00 : f32
    %245 = vector.broadcast %cst_98 : f32 to vector<16x32xf32>
    %246 = vector.extract_strided_slice %244 {offsets = [0, 0], sizes = [16, 8], strides = [1, 1]} : vector<16x96xf32> to vector<16x8xf32>
    %247 = vector.shape_cast %246 : vector<16x8xf32> to vector<2x8x8xf32>
    %248 = vector.extract_strided_slice %244 {offsets = [0, 32], sizes = [16, 8], strides = [1, 1]} : vector<16x96xf32> to vector<16x8xf32>
    %249 = vector.shape_cast %248 : vector<16x8xf32> to vector<2x8x8xf32>
    %250 = vector.extract_strided_slice %244 {offsets = [0, 64], sizes = [16, 8], strides = [1, 1]} : vector<16x96xf32> to vector<16x8xf32>
    %251 = vector.shape_cast %250 : vector<16x8xf32> to vector<2x8x8xf32>
    %252 = arith.truncf %247 : vector<2x8x8xf32> to vector<2x8x8xbf16>
    %253 = arith.truncf %249 : vector<2x8x8xf32> to vector<2x8x8xbf16>
    "tpu.trace_start"() <{level = 10 : i32, message = "bqd,bkd->bqk"}> : () -> ()
    %cst_99 = arith.constant dense<0.000000e+00> : vector<2x8x8xf32>
    %254 = tpu.matmul %252, %253, %cst_99 {dimension_numbers = #tpu.dot_dimension_numbers<[2], [2], [1], [1], [0, 0, 0, 1, 1, 1], [0], [0]>} : vector<2x8x8xbf16>, vector<2x8x8xbf16>, vector<2x8x8xf32> -> vector<2x8x8xf32>
    "tpu.trace_stop"() : () -> ()
    %255 = vector.broadcast %0 : vector<2x1x8xf32> to vector<2x8x8xf32>
    %256 = arith.addf %254, %255 : vector<2x8x8xf32>
    %cst_100 = arith.constant dense<0xFF800000> : vector<2x8xf32>
    %257 = vector.multi_reduction <maximumf>, %256, %cst_100 [2] : vector<2x8x8xf32> to vector<2x8xf32>
    %258 = vector.shape_cast %257 : vector<2x8xf32> to vector<2x8x1xf32>
    %259 = vector.broadcast %258 : vector<2x8x1xf32> to vector<2x8x8xf32>
    %260 = arith.subf %256, %259 : vector<2x8x8xf32>
    %261 = math.exp %260 : vector<2x8x8xf32>
    %cst_101 = arith.constant dense<0.000000e+00> : vector<2x8xf32>
    %262 = vector.multi_reduction <add>, %261, %cst_101 [2] : vector<2x8x8xf32> to vector<2x8xf32>
    %263 = vector.shape_cast %262 : vector<2x8xf32> to vector<2x8x1xf32>
    %264 = tpu.reciprocal %263 {approx = true} : vector<2x8x1xf32> -> vector<2x8x1xf32>
    %265 = vector.broadcast %264 : vector<2x8x1xf32> to vector<2x8x8xf32>
    %266 = arith.mulf %261, %265 : vector<2x8x8xf32>
    %267 = arith.truncf %266 : vector<2x8x8xf32> to vector<2x8x8xbf16>
    %268 = arith.truncf %251 : vector<2x8x8xf32> to vector<2x8x8xbf16>
    "tpu.trace_start"() <{level = 10 : i32, message = "bqk,bkd->bqd"}> : () -> ()
    %cst_102 = arith.constant dense<0.000000e+00> : vector<2x8x8xf32>
    %269 = tpu.matmul %267, %268, %cst_102 {dimension_numbers = #tpu.dot_dimension_numbers<[2], [1], [1], [2], [0, 0, 0, 1, 1, 2], [0], [0]>} : vector<2x8x8xbf16>, vector<2x8x8xbf16>, vector<2x8x8xf32> -> vector<2x8x8xf32>
    "tpu.trace_stop"() : () -> ()
    %270 = vector.shape_cast %269 : vector<2x8x8xf32> to vector<16x8xf32>
    %271 = arith.truncf %270 : vector<16x8xf32> to vector<16x8xbf16>
    %c4 = arith.constant 4 : index
    %c0_103 = arith.constant 0 : index
    %c0_104 = arith.constant 0 : index
    %272 = vector.load %arg6[%c4, %c0_103, %c0_104] : memref<8x8x32xbf16, #tpu.memory_space<vmem>>, vector<1x8x32xbf16>
    %273 = vector.shape_cast %272 : vector<1x8x32xbf16> to vector<8x32xbf16>
    %cst_105 = arith.constant dense<0.000000e+00> : vector<16x32xf32>
    %274 = tpu.matmul %271, %273, %cst_105 {dimension_numbers = #tpu.dot_dimension_numbers<[1], [0], [0], [1], [0, 0, 1, 1], [], []>} : vector<16x8xbf16>, vector<8x32xbf16>, vector<16x32xf32> -> vector<16x32xf32>
    %275 = arith.addf %245, %274 : vector<16x32xf32>
    %276 = vector.extract_strided_slice %244 {offsets = [0, 8], sizes = [16, 8], strides = [1, 1]} : vector<16x96xf32> to vector<16x8xf32>
    %277 = vector.shape_cast %276 : vector<16x8xf32> to vector<2x8x8xf32>
    %278 = vector.extract_strided_slice %244 {offsets = [0, 40], sizes = [16, 8], strides = [1, 1]} : vector<16x96xf32> to vector<16x8xf32>
    %279 = vector.shape_cast %278 : vector<16x8xf32> to vector<2x8x8xf32>
    %280 = vector.extract_strided_slice %244 {offsets = [0, 72], sizes = [16, 8], strides = [1, 1]} : vector<16x96xf32> to vector<16x8xf32>
    %281 = vector.shape_cast %280 : vector<16x8xf32> to vector<2x8x8xf32>
    %282 = arith.truncf %277 : vector<2x8x8xf32> to vector<2x8x8xbf16>
    %283 = arith.truncf %279 : vector<2x8x8xf32> to vector<2x8x8xbf16>
    "tpu.trace_start"() <{level = 10 : i32, message = "bqd,bkd->bqk"}> : () -> ()
    %cst_106 = arith.constant dense<0.000000e+00> : vector<2x8x8xf32>
    %284 = tpu.matmul %282, %283, %cst_106 {dimension_numbers = #tpu.dot_dimension_numbers<[2], [2], [1], [1], [0, 0, 0, 1, 1, 1], [0], [0]>} : vector<2x8x8xbf16>, vector<2x8x8xbf16>, vector<2x8x8xf32> -> vector<2x8x8xf32>
    "tpu.trace_stop"() : () -> ()
    %285 = vector.broadcast %0 : vector<2x1x8xf32> to vector<2x8x8xf32>
    %286 = arith.addf %284, %285 : vector<2x8x8xf32>
    %cst_107 = arith.constant dense<0xFF800000> : vector<2x8xf32>
    %287 = vector.multi_reduction <maximumf>, %286, %cst_107 [2] : vector<2x8x8xf32> to vector<2x8xf32>
    %288 = vector.shape_cast %287 : vector<2x8xf32> to vector<2x8x1xf32>
    %289 = vector.broadcast %288 : vector<2x8x1xf32> to vector<2x8x8xf32>
    %290 = arith.subf %286, %289 : vector<2x8x8xf32>
    %291 = math.exp %290 : vector<2x8x8xf32>
    %cst_108 = arith.constant dense<0.000000e+00> : vector<2x8xf32>
    %292 = vector.multi_reduction <add>, %291, %cst_108 [2] : vector<2x8x8xf32> to vector<2x8xf32>
    %293 = vector.shape_cast %292 : vector<2x8xf32> to vector<2x8x1xf32>
    %294 = tpu.reciprocal %293 {approx = true} : vector<2x8x1xf32> -> vector<2x8x1xf32>
    %295 = vector.broadcast %294 : vector<2x8x1xf32> to vector<2x8x8xf32>
    %296 = arith.mulf %291, %295 : vector<2x8x8xf32>
    %297 = arith.truncf %296 : vector<2x8x8xf32> to vector<2x8x8xbf16>
    %298 = arith.truncf %281 : vector<2x8x8xf32> to vector<2x8x8xbf16>
    "tpu.trace_start"() <{level = 10 : i32, message = "bqk,bkd->bqd"}> : () -> ()
    %cst_109 = arith.constant dense<0.000000e+00> : vector<2x8x8xf32>
    %299 = tpu.matmul %297, %298, %cst_109 {dimension_numbers = #tpu.dot_dimension_numbers<[2], [1], [1], [2], [0, 0, 0, 1, 1, 2], [0], [0]>} : vector<2x8x8xbf16>, vector<2x8x8xbf16>, vector<2x8x8xf32> -> vector<2x8x8xf32>
    "tpu.trace_stop"() : () -> ()
    %300 = vector.shape_cast %299 : vector<2x8x8xf32> to vector<16x8xf32>
    %301 = arith.truncf %300 : vector<16x8xf32> to vector<16x8xbf16>
    %c5 = arith.constant 5 : index
    %c0_110 = arith.constant 0 : index
    %c0_111 = arith.constant 0 : index
    %302 = vector.load %arg6[%c5, %c0_110, %c0_111] : memref<8x8x32xbf16, #tpu.memory_space<vmem>>, vector<1x8x32xbf16>
    %303 = vector.shape_cast %302 : vector<1x8x32xbf16> to vector<8x32xbf16>
    %cst_112 = arith.constant dense<0.000000e+00> : vector<16x32xf32>
    %304 = tpu.matmul %301, %303, %cst_112 {dimension_numbers = #tpu.dot_dimension_numbers<[1], [0], [0], [1], [0, 0, 1, 1], [], []>} : vector<16x8xbf16>, vector<8x32xbf16>, vector<16x32xf32> -> vector<16x32xf32>
    %305 = arith.addf %275, %304 : vector<16x32xf32>
    %306 = vector.extract_strided_slice %244 {offsets = [0, 16], sizes = [16, 8], strides = [1, 1]} : vector<16x96xf32> to vector<16x8xf32>
    %307 = vector.shape_cast %306 : vector<16x8xf32> to vector<2x8x8xf32>
    %308 = vector.extract_strided_slice %244 {offsets = [0, 48], sizes = [16, 8], strides = [1, 1]} : vector<16x96xf32> to vector<16x8xf32>
    %309 = vector.shape_cast %308 : vector<16x8xf32> to vector<2x8x8xf32>
    %310 = vector.extract_strided_slice %244 {offsets = [0, 80], sizes = [16, 8], strides = [1, 1]} : vector<16x96xf32> to vector<16x8xf32>
    %311 = vector.shape_cast %310 : vector<16x8xf32> to vector<2x8x8xf32>
    %312 = arith.truncf %307 : vector<2x8x8xf32> to vector<2x8x8xbf16>
    %313 = arith.truncf %309 : vector<2x8x8xf32> to vector<2x8x8xbf16>
    "tpu.trace_start"() <{level = 10 : i32, message = "bqd,bkd->bqk"}> : () -> ()
    %cst_113 = arith.constant dense<0.000000e+00> : vector<2x8x8xf32>
    %314 = tpu.matmul %312, %313, %cst_113 {dimension_numbers = #tpu.dot_dimension_numbers<[2], [2], [1], [1], [0, 0, 0, 1, 1, 1], [0], [0]>} : vector<2x8x8xbf16>, vector<2x8x8xbf16>, vector<2x8x8xf32> -> vector<2x8x8xf32>
    "tpu.trace_stop"() : () -> ()
    %315 = vector.broadcast %0 : vector<2x1x8xf32> to vector<2x8x8xf32>
    %316 = arith.addf %314, %315 : vector<2x8x8xf32>
    %cst_114 = arith.constant dense<0xFF800000> : vector<2x8xf32>
    %317 = vector.multi_reduction <maximumf>, %316, %cst_114 [2] : vector<2x8x8xf32> to vector<2x8xf32>
    %318 = vector.shape_cast %317 : vector<2x8xf32> to vector<2x8x1xf32>
    %319 = vector.broadcast %318 : vector<2x8x1xf32> to vector<2x8x8xf32>
    %320 = arith.subf %316, %319 : vector<2x8x8xf32>
    %321 = math.exp %320 : vector<2x8x8xf32>
    %cst_115 = arith.constant dense<0.000000e+00> : vector<2x8xf32>
    %322 = vector.multi_reduction <add>, %321, %cst_115 [2] : vector<2x8x8xf32> to vector<2x8xf32>
    %323 = vector.shape_cast %322 : vector<2x8xf32> to vector<2x8x1xf32>
    %324 = tpu.reciprocal %323 {approx = true} : vector<2x8x1xf32> -> vector<2x8x1xf32>
    %325 = vector.broadcast %324 : vector<2x8x1xf32> to vector<2x8x8xf32>
    %326 = arith.mulf %321, %325 : vector<2x8x8xf32>
    %327 = arith.truncf %326 : vector<2x8x8xf32> to vector<2x8x8xbf16>
    %328 = arith.truncf %311 : vector<2x8x8xf32> to vector<2x8x8xbf16>
    "tpu.trace_start"() <{level = 10 : i32, message = "bqk,bkd->bqd"}> : () -> ()
    %cst_116 = arith.constant dense<0.000000e+00> : vector<2x8x8xf32>
    %329 = tpu.matmul %327, %328, %cst_116 {dimension_numbers = #tpu.dot_dimension_numbers<[2], [1], [1], [2], [0, 0, 0, 1, 1, 2], [0], [0]>} : vector<2x8x8xbf16>, vector<2x8x8xbf16>, vector<2x8x8xf32> -> vector<2x8x8xf32>
    "tpu.trace_stop"() : () -> ()
    %330 = vector.shape_cast %329 : vector<2x8x8xf32> to vector<16x8xf32>
    %331 = arith.truncf %330 : vector<16x8xf32> to vector<16x8xbf16>
    %c6 = arith.constant 6 : index
    %c0_117 = arith.constant 0 : index
    %c0_118 = arith.constant 0 : index
    %332 = vector.load %arg6[%c6, %c0_117, %c0_118] : memref<8x8x32xbf16, #tpu.memory_space<vmem>>, vector<1x8x32xbf16>
    %333 = vector.shape_cast %332 : vector<1x8x32xbf16> to vector<8x32xbf16>
    %cst_119 = arith.constant dense<0.000000e+00> : vector<16x32xf32>
    %334 = tpu.matmul %331, %333, %cst_119 {dimension_numbers = #tpu.dot_dimension_numbers<[1], [0], [0], [1], [0, 0, 1, 1], [], []>} : vector<16x8xbf16>, vector<8x32xbf16>, vector<16x32xf32> -> vector<16x32xf32>
    %335 = arith.addf %305, %334 : vector<16x32xf32>
    %336 = vector.extract_strided_slice %244 {offsets = [0, 24], sizes = [16, 8], strides = [1, 1]} : vector<16x96xf32> to vector<16x8xf32>
    %337 = vector.shape_cast %336 : vector<16x8xf32> to vector<2x8x8xf32>
    %338 = vector.extract_strided_slice %244 {offsets = [0, 56], sizes = [16, 8], strides = [1, 1]} : vector<16x96xf32> to vector<16x8xf32>
    %339 = vector.shape_cast %338 : vector<16x8xf32> to vector<2x8x8xf32>
    %340 = vector.extract_strided_slice %244 {offsets = [0, 88], sizes = [16, 8], strides = [1, 1]} : vector<16x96xf32> to vector<16x8xf32>
    %341 = vector.shape_cast %340 : vector<16x8xf32> to vector<2x8x8xf32>
    %342 = arith.truncf %337 : vector<2x8x8xf32> to vector<2x8x8xbf16>
    %343 = arith.truncf %339 : vector<2x8x8xf32> to vector<2x8x8xbf16>
    "tpu.trace_start"() <{level = 10 : i32, message = "bqd,bkd->bqk"}> : () -> ()
    %cst_120 = arith.constant dense<0.000000e+00> : vector<2x8x8xf32>
    %344 = tpu.matmul %342, %343, %cst_120 {dimension_numbers = #tpu.dot_dimension_numbers<[2], [2], [1], [1], [0, 0, 0, 1, 1, 1], [0], [0]>} : vector<2x8x8xbf16>, vector<2x8x8xbf16>, vector<2x8x8xf32> -> vector<2x8x8xf32>
    "tpu.trace_stop"() : () -> ()
    %345 = vector.broadcast %0 : vector<2x1x8xf32> to vector<2x8x8xf32>
    %346 = arith.addf %344, %345 : vector<2x8x8xf32>
    %cst_121 = arith.constant dense<0xFF800000> : vector<2x8xf32>
    %347 = vector.multi_reduction <maximumf>, %346, %cst_121 [2] : vector<2x8x8xf32> to vector<2x8xf32>
    %348 = vector.shape_cast %347 : vector<2x8xf32> to vector<2x8x1xf32>
    %349 = vector.broadcast %348 : vector<2x8x1xf32> to vector<2x8x8xf32>
    %350 = arith.subf %346, %349 : vector<2x8x8xf32>
    %351 = math.exp %350 : vector<2x8x8xf32>
    %cst_122 = arith.constant dense<0.000000e+00> : vector<2x8xf32>
    %352 = vector.multi_reduction <add>, %351, %cst_122 [2] : vector<2x8x8xf32> to vector<2x8xf32>
    %353 = vector.shape_cast %352 : vector<2x8xf32> to vector<2x8x1xf32>
    %354 = tpu.reciprocal %353 {approx = true} : vector<2x8x1xf32> -> vector<2x8x1xf32>
    %355 = vector.broadcast %354 : vector<2x8x1xf32> to vector<2x8x8xf32>
    %356 = arith.mulf %351, %355 : vector<2x8x8xf32>
    %357 = arith.truncf %356 : vector<2x8x8xf32> to vector<2x8x8xbf16>
    %358 = arith.truncf %341 : vector<2x8x8xf32> to vector<2x8x8xbf16>
    "tpu.trace_start"() <{level = 10 : i32, message = "bqk,bkd->bqd"}> : () -> ()
    %cst_123 = arith.constant dense<0.000000e+00> : vector<2x8x8xf32>
    %359 = tpu.matmul %357, %358, %cst_123 {dimension_numbers = #tpu.dot_dimension_numbers<[2], [1], [1], [2], [0, 0, 0, 1, 1, 2], [0], [0]>} : vector<2x8x8xbf16>, vector<2x8x8xbf16>, vector<2x8x8xf32> -> vector<2x8x8xf32>
    "tpu.trace_stop"() : () -> ()
    %360 = vector.shape_cast %359 : vector<2x8x8xf32> to vector<16x8xf32>
    %361 = arith.truncf %360 : vector<16x8xf32> to vector<16x8xbf16>
    %c7 = arith.constant 7 : index
    %c0_124 = arith.constant 0 : index
    %c0_125 = arith.constant 0 : index
    %362 = vector.load %arg6[%c7, %c0_124, %c0_125] : memref<8x8x32xbf16, #tpu.memory_space<vmem>>, vector<1x8x32xbf16>
    %363 = vector.shape_cast %362 : vector<1x8x32xbf16> to vector<8x32xbf16>
    %cst_126 = arith.constant dense<0.000000e+00> : vector<16x32xf32>
    %364 = tpu.matmul %361, %363, %cst_126 {dimension_numbers = #tpu.dot_dimension_numbers<[1], [0], [0], [1], [0, 0, 1, 1], [], []>} : vector<16x8xbf16>, vector<8x32xbf16>, vector<16x32xf32> -> vector<16x32xf32>
    %365 = arith.addf %335, %364 : vector<16x32xf32>
    %c1_127 = arith.constant 1 : index
    %c0_128 = arith.constant 0 : index
    %c0_129 = arith.constant 0 : index
    %366 = vector.load %arg7[%c1_127, %c0_128, %c0_129] : memref<2x1x32xf32, #tpu.memory_space<vmem>>, vector<1x1x32xf32>
    %367 = vector.shape_cast %366 : vector<1x1x32xf32> to vector<1x32xf32>
    %368 = vector.broadcast %367 : vector<1x32xf32> to vector<16x32xf32>
    %369 = arith.addf %365, %368 : vector<16x32xf32>
    %370 = arith.addf %369, %236 : vector<16x32xf32>
    %c1_130 = arith.constant 1 : index
    %c0_131 = arith.constant 0 : index
    %c0_132 = arith.constant 0 : index
    %371 = vector.load %arg8[%c1_130, %c0_131, %c0_132] : memref<2x1x32xf32, #tpu.memory_space<vmem>>, vector<1x1x32xf32>
    %372 = vector.shape_cast %371 : vector<1x1x32xf32> to vector<1x32xf32>
    %c1_133 = arith.constant 1 : index
    %c0_134 = arith.constant 0 : index
    %c0_135 = arith.constant 0 : index
    %373 = vector.load %arg9[%c1_133, %c0_134, %c0_135] : memref<2x1x32xf32, #tpu.memory_space<vmem>>, vector<1x1x32xf32>
    %374 = vector.shape_cast %373 : vector<1x1x32xf32> to vector<1x32xf32>
    %cst_136 = arith.constant dense<0.000000e+00> : vector<16xf32>
    %375 = vector.multi_reduction <add>, %370, %cst_136 [1] : vector<16x32xf32> to vector<16xf32>
    %376 = vector.shape_cast %375 : vector<16xf32> to vector<16x1xf32>
    %cst_137 = arith.constant 3.200000e+01 : f32
    %377 = vector.broadcast %cst_137 : f32 to vector<16x1xf32>
    %378 = arith.divf %376, %377 : vector<16x1xf32>
    %379 = vector.broadcast %378 : vector<16x1xf32> to vector<16x32xf32>
    %380 = arith.subf %370, %379 : vector<16x32xf32>
    %381 = arith.mulf %380, %380 : vector<16x32xf32>
    %cst_138 = arith.constant dense<0.000000e+00> : vector<16xf32>
    %382 = vector.multi_reduction <add>, %381, %cst_138 [1] : vector<16x32xf32> to vector<16xf32>
    %383 = vector.shape_cast %382 : vector<16xf32> to vector<16x1xf32>
    %cst_139 = arith.constant 3.200000e+01 : f32
    %384 = vector.broadcast %cst_139 : f32 to vector<16x1xf32>
    %385 = arith.divf %383, %384 : vector<16x1xf32>
    %386 = vector.broadcast %378 : vector<16x1xf32> to vector<16x32xf32>
    %387 = arith.subf %370, %386 : vector<16x32xf32>
    %cst_140 = arith.constant 9.99999974E-6 : f32
    %388 = vector.broadcast %cst_140 : f32 to vector<16x1xf32>
    %389 = arith.addf %385, %388 : vector<16x1xf32>
    %390 = math.rsqrt %389 : vector<16x1xf32>
    %391 = vector.broadcast %390 : vector<16x1xf32> to vector<16x32xf32>
    %392 = arith.mulf %387, %391 : vector<16x32xf32>
    %393 = vector.broadcast %372 : vector<1x32xf32> to vector<16x32xf32>
    %394 = arith.mulf %392, %393 : vector<16x32xf32>
    %395 = vector.broadcast %374 : vector<1x32xf32> to vector<16x32xf32>
    %396 = arith.addf %394, %395 : vector<16x32xf32>
    %c1_141 = arith.constant 1 : index
    %c0_142 = arith.constant 0 : index
    %c0_143 = arith.constant 0 : index
    %397 = vector.load %arg10[%c1_141, %c0_142, %c0_143] : memref<2x32x64xbf16, #tpu.memory_space<vmem>>, vector<1x32x64xbf16>
    %398 = vector.shape_cast %397 : vector<1x32x64xbf16> to vector<32x64xbf16>
    %399 = arith.truncf %396 : vector<16x32xf32> to vector<16x32xbf16>
    %cst_144 = arith.constant dense<0.000000e+00> : vector<16x64xf32>
    %400 = tpu.matmul %399, %398, %cst_144 {dimension_numbers = #tpu.dot_dimension_numbers<[1], [0], [0], [1], [0, 0, 1, 1], [], []>} : vector<16x32xbf16>, vector<32x64xbf16>, vector<16x64xf32> -> vector<16x64xf32>
    %c1_145 = arith.constant 1 : index
    %c0_146 = arith.constant 0 : index
    %c0_147 = arith.constant 0 : index
    %401 = vector.load %arg11[%c1_145, %c0_146, %c0_147] : memref<2x1x64xf32, #tpu.memory_space<vmem>>, vector<1x1x64xf32>
    %402 = vector.shape_cast %401 : vector<1x1x64xf32> to vector<1x64xf32>
    %403 = vector.broadcast %402 : vector<1x64xf32> to vector<16x64xf32>
    %404 = arith.addf %400, %403 : vector<16x64xf32>
    %cst_148 = arith.constant 5.000000e-01 : f32
    %405 = vector.broadcast %cst_148 : f32 to vector<16x64xf32>
    %406 = arith.mulf %405, %404 : vector<16x64xf32>
    %cst_149 = arith.constant 0.707106769 : f32
    %407 = vector.broadcast %cst_149 : f32 to vector<16x64xf32>
    %408 = arith.mulf %404, %407 : vector<16x64xf32>
    %409 = math.erf %408 : vector<16x64xf32>
    %cst_150 = arith.constant 1.000000e+00 : f32
    %410 = vector.broadcast %cst_150 : f32 to vector<16x64xf32>
    %411 = arith.addf %410, %409 : vector<16x64xf32>
    %412 = arith.mulf %406, %411 : vector<16x64xf32>
    %c1_151 = arith.constant 1 : index
    %c0_152 = arith.constant 0 : index
    %c0_153 = arith.constant 0 : index
    %413 = vector.load %arg12[%c1_151, %c0_152, %c0_153] : memref<2x64x32xbf16, #tpu.memory_space<vmem>>, vector<1x64x32xbf16>
    %414 = vector.shape_cast %413 : vector<1x64x32xbf16> to vector<64x32xbf16>
    %415 = arith.truncf %412 : vector<16x64xf32> to vector<16x64xbf16>
    %cst_154 = arith.constant dense<0.000000e+00> : vector<16x32xf32>
    %416 = tpu.matmul %415, %414, %cst_154 {dimension_numbers = #tpu.dot_dimension_numbers<[1], [0], [0], [1], [0, 0, 1, 1], [], []>} : vector<16x64xbf16>, vector<64x32xbf16>, vector<16x32xf32> -> vector<16x32xf32>
    %c1_155 = arith.constant 1 : index
    %c0_156 = arith.constant 0 : index
    %c0_157 = arith.constant 0 : index
    %417 = vector.load %arg13[%c1_155, %c0_156, %c0_157] : memref<2x1x32xf32, #tpu.memory_space<vmem>>, vector<1x1x32xf32>
    %418 = vector.shape_cast %417 : vector<1x1x32xf32> to vector<1x32xf32>
    %419 = vector.broadcast %418 : vector<1x32xf32> to vector<16x32xf32>
    %420 = arith.addf %416, %419 : vector<16x32xf32>
    %421 = arith.addf %420, %396 : vector<16x32xf32>
    %c1_158 = arith.constant 1 : index
    %c0_159 = arith.constant 0 : index
    %c0_160 = arith.constant 0 : index
    %422 = vector.load %arg14[%c1_158, %c0_159, %c0_160] : memref<2x1x32xf32, #tpu.memory_space<vmem>>, vector<1x1x32xf32>
    %423 = vector.shape_cast %422 : vector<1x1x32xf32> to vector<1x32xf32>
    %c1_161 = arith.constant 1 : index
    %c0_162 = arith.constant 0 : index
    %c0_163 = arith.constant 0 : index
    %424 = vector.load %arg15[%c1_161, %c0_162, %c0_163] : memref<2x1x32xf32, #tpu.memory_space<vmem>>, vector<1x1x32xf32>
    %425 = vector.shape_cast %424 : vector<1x1x32xf32> to vector<1x32xf32>
    %cst_164 = arith.constant dense<0.000000e+00> : vector<16xf32>
    %426 = vector.multi_reduction <add>, %421, %cst_164 [1] : vector<16x32xf32> to vector<16xf32>
    %427 = vector.shape_cast %426 : vector<16xf32> to vector<16x1xf32>
    %cst_165 = arith.constant 3.200000e+01 : f32
    %428 = vector.broadcast %cst_165 : f32 to vector<16x1xf32>
    %429 = arith.divf %427, %428 : vector<16x1xf32>
    %430 = vector.broadcast %429 : vector<16x1xf32> to vector<16x32xf32>
    %431 = arith.subf %421, %430 : vector<16x32xf32>
    %432 = arith.mulf %431, %431 : vector<16x32xf32>
    %cst_166 = arith.constant dense<0.000000e+00> : vector<16xf32>
    %433 = vector.multi_reduction <add>, %432, %cst_166 [1] : vector<16x32xf32> to vector<16xf32>
    %434 = vector.shape_cast %433 : vector<16xf32> to vector<16x1xf32>
    %cst_167 = arith.constant 3.200000e+01 : f32
    %435 = vector.broadcast %cst_167 : f32 to vector<16x1xf32>
    %436 = arith.divf %434, %435 : vector<16x1xf32>
    %437 = vector.broadcast %429 : vector<16x1xf32> to vector<16x32xf32>
    %438 = arith.subf %421, %437 : vector<16x32xf32>
    %cst_168 = arith.constant 9.99999974E-6 : f32
    %439 = vector.broadcast %cst_168 : f32 to vector<16x1xf32>
    %440 = arith.addf %436, %439 : vector<16x1xf32>
    %441 = math.rsqrt %440 : vector<16x1xf32>
    %442 = vector.broadcast %441 : vector<16x1xf32> to vector<16x32xf32>
    %443 = arith.mulf %438, %442 : vector<16x32xf32>
    %444 = vector.broadcast %423 : vector<1x32xf32> to vector<16x32xf32>
    %445 = arith.mulf %443, %444 : vector<16x32xf32>
    %446 = vector.broadcast %425 : vector<1x32xf32> to vector<16x32xf32>
    %447 = arith.addf %445, %446 : vector<16x32xf32>
    %448 = vector.shape_cast %447 : vector<16x32xf32> to vector<2x8x32xf32>
    %449 = vector.extract_strided_slice %448 {offsets = [0, 0, 0], sizes = [2, 1, 32], strides = [1, 1, 1]} : vector<2x8x32xf32> to vector<2x1x32xf32>
    %450 = vector.shape_cast %449 : vector<2x1x32xf32> to vector<2x32xf32>
    %c0_169 = arith.constant 0 : index
    %c0_170 = arith.constant 0 : index
    %451 = vector.load %arg16[%c0_169, %c0_170] : memref<32x32xbf16, #tpu.memory_space<vmem>>, vector<32x32xbf16>
    %452 = arith.truncf %450 : vector<2x32xf32> to vector<2x32xbf16>
    %cst_171 = arith.constant dense<0.000000e+00> : vector<2x32xf32>
    %453 = tpu.matmul %452, %451, %cst_171 {dimension_numbers = #tpu.dot_dimension_numbers<[1], [0], [0], [1], [0, 0, 1, 1], [], []>} : vector<2x32xbf16>, vector<32x32xbf16>, vector<2x32xf32> -> vector<2x32xf32>
    %c0_172 = arith.constant 0 : index
    %c0_173 = arith.constant 0 : index
    %454 = vector.load %arg17[%c0_172, %c0_173] : memref<1x32xf32, #tpu.memory_space<vmem>>, vector<1x32xf32>
    %455 = vector.broadcast %454 : vector<1x32xf32> to vector<2x32xf32>
    %456 = arith.addf %453, %455 : vector<2x32xf32>
    %457 = math.tanh %456 : vector<2x32xf32>
    %c0_174 = arith.constant 0 : index
    %c0_175 = arith.constant 0 : index
    %458 = vector.load %arg18[%c0_174, %c0_175] : memref<2x32xf32, #tpu.memory_space<vmem>>, vector<2x32xf32>
    tpu.vector_store %arg18[%c0_174, %c0_175], %457 {strides = array<i32>} : memref<2x32xf32, #tpu.memory_space<vmem>>, vector<2x32xf32>,
    return
  }
}

</mosaic_0001>

<bundles_post_ra>
// kernel: forward.1
= control target key start
LH: loop header
LB: loop body
LE: loop exit
PB: predicated region body
PF: predicated region fallthrough
CT: control target
= control target key end

     0   :  { %s4473_s0 = inlined_call_operand.vmem [shape: f32[16,32], index: 0, kind: input, shape index: {}]   ;;  %s4474_s1 = inlined_call_operand.vmem [shape: f32[2,1,8], index: 1, kind: input, shape index: {}]   ;;  %s4475_s2 = inlined_call_operand.vmem [shape: f32[1,32], index: 2, kind: input, shape index: {}]   ;;  %s4476_s3 = inlined_call_operand.vmem [shape: f32[1,32], index: 3, kind: input, shape index: {}]   ;;  %s4477_s4 = inlined_call_operand.vmem [shape: bf16[2,32,96], index: 4, kind: input, shape index: {}]   ;;  %s4478_s5 = inlined_call_operand.vmem [shape: f32[2,1,96], index: 5, kind: input, shape index: {}]   ;;  %s4479_s6 = inlined_call_operand.vmem [shape: bf16[8,8,32], index: 6, kind: input, shape index: {}]   ;;  %s4480_s7 = inlined_call_operand.vmem [shape: f32[2,1,32], index: 7, kind: input, shape index: {}]   ;;  %s4481_s8 = inlined_call_operand.vmem [shape: f32[2,1,32], index: 8, kind: input, shape index: {}]   ;;  %s4482_s9 = inlined_call_operand.vmem [shape: f32[2,1,32], index: 9, kind: input, shape index: {}]   ;;  %s4483_s10 = inlined_call_operand.vmem [shape: bf16[2,32,64], index: 10, kind: input, shape index: {}]   ;;  %s4484_s11 = inlined_call_operand.vmem [shape: f32[2,1,64], index: 11, kind: input, shape index: {}]   ;;  %s4485_s12 = inlined_call_operand.vmem [shape: bf16[2,64,32], index: 12, kind: input, shape index: {}]   ;;  %s4486_s13 = inlined_call_operand.vmem [shape: f32[2,1,32], index: 13, kind: input, shape index: {}]   ;;  %s4487_s14 = inlined_call_operand.vmem [shape: f32[2,1,32], index: 14, kind: input, shape index: {}]   ;;  %s4488_s15 = inlined_call_operand.vmem [shape: f32[2,1,32], index: 15, kind: input, shape index: {}]   ;;  %s4489_s16 = inlined_call_operand.vmem [shape: bf16[32,32], index: 16, kind: input, shape index: {}]   ;;  %s4490_s17 = inlined_call_operand.vmem [shape: f32[1,32], index: 17, kind: input, shape index: {}]   ;;  %s4491_s18 = inlined_call_operand.hbm [shape: f32[2,32], index: 18, kind: output, shape index: {}]  }
   0x1   :  { %4500 = sst [smem:[#allocation5_spill]] %s4473_s0 }
   0x2   :  { %4501 = sst [smem:[#allocation6_spill]] %s4474_s1 }
   0x3   :  { %4502 = sst [smem:[#allocation7_spill]] %s4475_s2 }
   0x4   :  { %s4503_s29 = sld [smem:[#allocation5_spill]]  ;;  %vm67_vm0 = vcmask 261120  }
   0xa   :  { %v63_v0 = vld [vmem:[%s4503_s29] sm:$0xff]  ;;  %v64_v1 = vld [vmem:[%s4503_s29 + $0x8] sm:$0xff] }
   0xb   :  { %v68_v2 = vsel %vm67_vm0, %v63_v0, 0.0  ;;  %v71_v3 = vsel %vm67_vm0, %v64_v1, 0.0 }
   0xc   :  { %69 = vadd.xlane.f32.xlu0 %v68_v2 }
  0x10   :  { %72 = vadd.xlane.f32.xlu0 %v71_v3 }
  0x11   :  { %23 = vsyncpa [#allocation3], 0  ;;  %v3599_v14 = vld [vmem:[%s4477_s4 + $0x8] sm:$0xff]   ;;  %v3735_v15 = vmov 0.0   ;;  %vm3736_vm1 = vmmov 0   ;;  %v3600_v16 = vld [vmem:[%s4477_s4] sm:$0xff]  }
  0x12   :  { %3281 = vmatprep.subr.bf16.mxu0 %v3735_v15  ;;  %3285 = vmatprep.mubr.msk.bf16.mxu0 %vm3736_vm1, %v3735_v15  ;;  %s4504_s23 = sld [smem:[#allocation7_spill]]  ;;  %v3060_v29 = vld [vmem:[%s4476_s3] ss:$0 sm:$0xff]  ;;  %s3737_s3 = smov 96   ;;  %vm196_vm2 = vcmask 64512   ;;  %vm321_vm3 = vcmask 1043456  }
  0x13   :  { %3282 = vmatpush3.bf16.msra.mxu0 %v3599_v14  ;;  %3289 = vmatprep.subr.bf16.mxu1 %v3735_v15  ;;  %v3061_v34 = vld [vmem:[%s4478_s5] ss:$0 sm:$0xff]  ;;  %s4505_s30 = sld [smem:[#allocation6_spill]]  ;;  %s3738_s1 = smov 64   ;;  %vm1449_vm4 = vcmask 523264   ;;  %vm2984_vm5 = vcmask 1041409  }
  0x14   :  { %3283 = vmatprep.subr.bf16.mxu0 %v3735_v15  ;;  %3291 = vmatprep.mubr.msk.bf16.mxu1 %vm3736_vm1, %v3735_v15  ;;  %s3739_s20 = smov 88   ;;  %s3740_s21 = smov 120   ;;  %vm3043_vm6 = vcmask 254976  }
  0x15   :  { %s3741_s22 = smov 56   ;;  %s3742_s2 = smov 80  }
  0x16   :  { %s3744_s28 = smov 48   ;;  %s4498_s29 = smov 72  }
  0x17   :  { %3284 = vmatpush3.bf16.msra.mxu0 %v3600_v16  ;;  %s4496_s0 = smov 104   ;;  %s4494_s25 = smov 40  }
  0x18   :  { %3295 = vmatprep.subr.bf16.mxu0 %v3735_v15  ;;  %v3059_v25 = vld [vmem:[%s4504_s23] ss:$0 sm:$0xff]  ;;  %s3743_s23 = smov 112   ;;  %s4508_s26 = smov 40  }
  0x19   :  { %v3909_v47 = vld [vmem:[%s4505_s30] ss:$0 sm:$0xff]  ;;  %v3915_v51 = vld [vmem:[%s4505_s30 + $0x1] ss:$0 sm:$0xff] }
  0x95   :  { %v70_v4 = vpop.xlane.xlu0 %69 }
  0x96   :  { %v75_v5 = vmul.f32 0.03125, %v70_v4 }
  0x98   :  { %v77_v6 = vsub.f32 %v63_v0, %v75_v5 }
  0x99   :  { %v73_v7 = vpop.xlane.xlu0 %72 }
  0x9a   :  { %v76_v8 = vmul.f32 0.03125, %v73_v7  ;;  %v79_v9 = vmul.f32 %v77_v6, %v77_v6 }
  0x9c   :  { %v78_v10 = vsub.f32 %v64_v1, %v76_v8  ;;  %v81_v11 = vsel %vm67_vm0, %v79_v9, 0.0 }
  0x9d   :  { %82 = vadd.xlane.f32.xlu1 %v81_v11 }
  0x9e   :  { %v80_v12 = vmul.f32 %v78_v10, %v78_v10 }
  0xa0   :  { %v84_v13 = vsel %vm67_vm0, %v80_v12, 0.0 }
  0xa1   :  { %85 = vadd.xlane.f32.xlu1 %v84_v13 }
 0x126   :  { %v83_v17 = vpop.xlane.xlu1 %82 }
 0x127   :  { %v87_v18 = vmul.f32 0.03125, %v83_v17 }
 0x129   :  { %v89_v19 = vadd.f32 1e-05, %v87_v18 }
 0x12a   :  { %v86_v20 = vpop.xlane.xlu1 %85 }
 0x12b   :  { %3617 = vrsqrt.f32 %v89_v19  ;;  %v88_v21 = vmul.f32 0.03125, %v86_v20 }
 0x12d   :  { %v90_v22 = vadd.f32 1e-05, %v88_v21 }
 0x12f   :  { %3619 = vrsqrt.f32 %v90_v22 }
 0x138   :  { %v3618_v23 = vpop.eup %3617 }
 0x139   :  { %v93_v24 = vmul.f32 %v3618_v23, %v77_v6 }
 0x13b   :  { %v101_v28 = vmul.f32 %v3059_v25, %v93_v24 }
 0x13c   :  { %v3620_v26 = vpop.eup %3619 }
 0x13d   :  { %v94_v27 = vmul.f32 %v3620_v26, %v78_v10  ;;  %v3874_v31 = vadd.f32 %v3060_v29, %v101_v28 }
 0x13f   :  { %v102_v30 = vmul.f32 %v3059_v25, %v94_v27 }
 0x141   :  { %v3876_v32 = vadd.f32 %v3060_v29, %v102_v30 }
 0x143   :  { %v115_v33 = vpack.c.bf16 %v3876_v32, %v3874_v31 }
 0x145   :  { %3286 = vmatmul.mubr.msk.bf16.vlgmr.msra.gmra.mxu0 %vm67_vm0, %v115_v33 }
 0x146   :  { %3297 = vmatprep.mubr.msk.bf16.mxu0 %vm3736_vm1, %v3735_v15 }
 0x205   :  { %v172_v35 = vpop.f32.mrf.mxu0 }
 0x206   :  { %v173_v36 = vadd.f32 %v3061_v34, %v172_v35 }
 0x207   :  { %v3287_v37 = vpop.f32.mrf.mxu0 }
 0x208   :  { %v3886_v38 = vpack.c.bf16 %v173_v36, %v173_v36 }
 0x209   :  { %v175_v39 = vpop.f32.mrf.mxu0 }
 0x20a   :  { %v176_v40 = vadd.f32 %v3061_v34, %v175_v39  ;;  %194 = vrot.lane.b32.xlu0 %v3886_v38, %s3737_s3 }
 0x20b   :  { %v3288_v41 = vpop.f32.mrf.mxu0 }
 0x20c   :  { %v3890_v42 = vpack.c.bf16 %v176_v40, %v176_v40 }
 0x20e   :  { %244 = vrot.lane.b32.xlu1 %v3890_v42, %s3737_s3 }
 0x27c   :  { %v195_v43 = vpop.permute.xlu0 %194 }
 0x27d   :  { %v201_v44 = vsel %vm196_vm2, %v195_v43, 0 }
 0x27e   :  { %3290 = vmatpush3.bf16.xpose.msra.mxu1 %v201_v44 }
 0x27f   :  { %3301 = vmatprep.subr.bf16.mxu1 %v3735_v15 }
 0x280   :  { %v245_v45 = vpop.permute.xlu1 %244 }
 0x281   :  { %v250_v46 = vsel %vm196_vm2, %v245_v45, 0 }
 0x282   :  { %3296 = vmatpush3.bf16.xpose.msra.mxu0 %v250_v46 }
 0x283   :  { %3307 = vmatprep.subr.bf16.mxu0 %v3735_v15 }
 0x285   :  { %3292 = vmatmul.mubr.msk.bf16.vlgmr.msra.gmra.mxu1 %vm196_vm2, %v3886_v38 }
 0x286   :  { %3303 = vmatprep.mubr.msk.bf16.mxu1 %vm3736_vm1, %v3735_v15 }
 0x289   :  { %3298 = vmatmul.mubr.msk.bf16.vlgmr.msra.gmra.mxu0 %vm196_vm2, %v3890_v42 }
 0x28a   :  { %3309 = vmatprep.mubr.msk.bf16.mxu0 %vm3736_vm1, %v3735_v15 }
 0x345   :  { %v237_v48 = vpop.f32.mrf.mxu1 }
 0x346   :  { %v238_v49 = vadd.f32 %v3909_v47, %v237_v48 }
 0x347   :  { %v3293_v50 = vpop.f32.mrf.mxu1 }
 0x348   :  { %v292_v52 = vsel %vm196_vm2, %v238_v49, -inf }
 0x349   :  { %v240_v53 = vpop.f32.mrf.mxu1  ;;  %v286_v54 = vpop.f32.mrf.mxu0  ;;  %293 = vmax.xlane.f32.xlu1 %v292_v52 }
 0x34a   :  { %v287_v55 = vadd.f32 %v3915_v51, %v286_v54 }
 0x34b   :  { %v3294_v56 = vpop.f32.mrf.mxu1  ;;  %v3299_v57 = vpop.f32.mrf.mxu0 }
 0x34c   :  { %v295_v58 = vsel %vm196_vm2, %v287_v55, -inf }
 0x34d   :  { %v289_v59 = vpop.f32.mrf.mxu0  ;;  %296 = vmax.xlane.f32.xlu0 %v295_v58 }
 0x34f   :  { %v3300_v60 = vpop.f32.mrf.mxu0 }
 0x35a   :  { %365 = vrot.lane.b32.xlu1 %v3890_v42, %s3738_s1 }
 0x35e   :  { %417 = vrot.lane.b32.xlu1 %v3886_v38, %s3739_s20 }
 0x3d2   :  { %v294_v61 = vpop.xlane.xlu1 %293 }
 0x3d3   :  { %v298_v62 = vsub.f32 %v238_v49, %v294_v61 }
 0x3d5   :  { %v300_v63 = vmul.f32 1.442695, %v298_v62 }
 0x3d6   :  { %v297_v0 = vpop.xlane.xlu0 %296  ;;  %v366_v1 = vpop.permute.xlu1 %365 }
 0x3d7   :  { %3621 = vpow2.f32 %v300_v63  ;;  %v299_v2 = vsub.f32 %v287_v55, %v297_v0  ;;  %v371_v3 = vsel %vm321_vm3, %v366_v1, 0 }
 0x3d8   :  { %3308 = vmatpush3.bf16.msra.mxu0 %v371_v3 }
 0x3d9   :  { %v302_v4 = vmul.f32 1.442695, %v299_v2  ;;  %3319 = vmatprep.subr.bf16.mxu0 %v3735_v15 }
 0x3da   :  { %v418_v9 = vpop.permute.xlu1 %417 }
 0x3db   :  { %3623 = vpow2.f32 %v302_v4  ;;  %v423_v19 = vsel %vm196_vm2, %v418_v9, 0  ;;  %v414_v9 = vld [vmem:[%s4479_s6] sm:$0xf] }
 0x3e4   :  { %v3622_v5 = vpop.eup %3621 }
 0x3e5   :  { %v304_v6 = vsel %vm196_vm2, %v3622_v5, 0.0 }
 0x3e6   :  { %305 = vadd.xlane.f32.xlu0 %v304_v6 }
 0x3e8   :  { %v3624_v7 = vpop.eup %3623 }
 0x3e9   :  { %v307_v8 = vsel %vm196_vm2, %v3624_v7, 0.0 }
 0x3ea   :  { %308 = vadd.xlane.f32.xlu1 %v307_v8 }
 0x3fb   :  { %467 = vrot.lane.b32.xlu1 %v3890_v42, %s3739_s20 }
 0x3fc   :  { %316 = vrot.lane.b32.xlu0 %v3886_v38, %s3738_s1 }
 0x3ff   :  { %465 = vrot.lane.b32.xlu1 %v3890_v42, %s3740_s21 }
 0x400   :  { %415 = vrot.lane.b32.xlu0 %v3886_v38, %s3740_s21 }
 0x46f   :  { %v306_v10 = vpop.xlane.xlu0 %305 }
 0x470   :  { %3625 = vrcp.f32 %v306_v10 }
 0x473   :  { %v317_v11 = vpop.permute.xlu0 %316  ;;  %v309_v12 = vpop.xlane.xlu1 %308 }
 0x474   :  { %v323_v13 = vsel %vm321_vm3, %v317_v11, 0  ;;  %3627 = vrcp.f32 %v309_v12  ;;  %v689_v12 = vsel %vm321_vm3, %v414_v9, 0 }
 0x475   :  { %3302 = vmatpush3.bf16.msra.mxu1 %v323_v13 }
 0x476   :  { %3313 = vmatprep.subr.bf16.mxu1 %v3735_v15 }
 0x477   :  { %v468_v21 = vpop.permute.xlu1 %467  ;;  %v416_v24 = vpop.permute.xlu0 %415 }
 0x478   :  { %v473_v23 = vsel %vm196_vm2, %v468_v21, 0 }
 0x47b   :  { %v466_v25 = vpop.permute.xlu1 %465 }
 0x47d   :  { %v3626_v14 = vpop.eup %3625 }
 0x47e   :  { %v312_v16 = vmul.f32 %v3626_v14, %v3622_v5 }
 0x480   :  { %v314_v17 = vpack.c.bf16 %v312_v16, %v312_v16 }
 0x481   :  { %v3628_v18 = vpop.eup %3627 }
 0x482   :  { %3304 = vmatmul.mubr.msk.bf16.vlgmr.msra.gmra.mxu1 %vm196_vm2, %v314_v17  ;;  %v313_v20 = vmul.f32 %v3628_v18, %v3624_v7  ;;  %v3075_v18 = vld [vmem:[%s4479_s6 + $0x4] sm:$0xf] }
 0x483   :  { %3314 = vmatpush3.bf16.xpose.msra.mxu1 %v423_v19  ;;  %3315 = vmatprep.mubr.msk.bf16.mxu1 %vm3736_vm1, %v3735_v15  ;;  %v642_v19 = vsel %vm321_vm3, %v3075_v18, 0 }
 0x484   :  { %v315_v22 = vpack.c.bf16 %v313_v20, %v313_v20  ;;  %3325 = vmatprep.subr.bf16.mxu1 %v3735_v15 }
 0x486   :  { %3310 = vmatmul.mubr.msk.bf16.vlgmr.msra.gmra.mxu0 %vm196_vm2, %v315_v22 }
 0x487   :  { %3320 = vmatpush3.bf16.xpose.msra.mxu0 %v473_v23  ;;  %3321 = vmatprep.mubr.msk.bf16.mxu0 %vm3736_vm1, %v3735_v15 }
 0x488   :  { %3331 = vmatprep.subr.bf16.mxu0 %v3735_v15 }
 0x48a   :  { %3316 = vmatmul.mubr.msk.bf16.vlgmr.msra.gmra.mxu1 %vm196_vm2, %v416_v24 }
 0x48b   :  { %3327 = vmatprep.mubr.msk.bf16.mxu1 %vm3736_vm1, %v3735_v15 }
 0x48e   :  { %3322 = vmatmul.mubr.msk.bf16.vlgmr.msra.gmra.mxu0 %vm196_vm2, %v466_v25 }
 0x48f   :  { %3333 = vmatprep.mubr.msk.bf16.mxu0 %vm3736_vm1, %v3735_v15 }
 0x542   :  { %v3954_v26 = vpop.f32.mrf.mxu1 }
 0x544   :  { %v3305_v27 = vpop.f32.mrf.mxu1 }
 0x546   :  { %v362_v28 = vpop.f32.mrf.mxu1  ;;  %v3956_v29 = vpop.f32.mrf.mxu0 }
 0x547   :  { %v413_v30 = vpack.c.bf16 %v3956_v29, %v3954_v26 }
 0x548   :  { %v3306_v33 = vpop.f32.mrf.mxu1  ;;  %v3311_v34 = vpop.f32.mrf.mxu0 }
 0x54a   :  { %v410_v35 = vpop.f32.mrf.mxu0  ;;  %v459_v36 = vpop.f32.mrf.mxu1 }
 0x54b   :  { %v460_v37 = vadd.f32 %v3909_v47, %v459_v36 }
 0x54c   :  { %v3312_v39 = vpop.f32.mrf.mxu0  ;;  %v3317_v40 = vpop.f32.mrf.mxu1 }
 0x54d   :  { %v515_v41 = vsel %vm196_vm2, %v460_v37, -inf }
 0x54e   :  { %516 = vmax.xlane.f32.xlu0 %v515_v41  ;;  %v462_v43 = vpop.f32.mrf.mxu1  ;;  %v509_v44 = vpop.f32.mrf.mxu0 }
 0x54f   :  { %v510_v45 = vadd.f32 %v3915_v51, %v509_v44 }
 0x550   :  { %v3318_v46 = vpop.f32.mrf.mxu1  ;;  %v3323_v48 = vpop.f32.mrf.mxu0 }
 0x551   :  { %v518_v49 = vsel %vm196_vm2, %v510_v45, -inf }
 0x552   :  { %519 = vmax.xlane.f32.xlu1 %v518_v49  ;;  %v512_v50 = vpop.f32.mrf.mxu0 }
 0x554   :  { %v3324_v52 = vpop.f32.mrf.mxu0 }
 0x563   :  { %587 = vrot.lane.b32.xlu1 %v3890_v42, %s3741_s22 }
 0x567   :  { %734 = vrot.lane.b32.xlu1 %v3886_v38, %s3742_s2 }
 0x56b   :  { %784 = vrot.lane.b32.xlu1 %v3890_v42, %s3742_s2 }
 0x56f   :  { %782 = vrot.lane.b32.xlu1 %v3890_v42, %s3743_s23 }
 0x5d7   :  { %v517_v53 = vpop.xlane.xlu0 %516 }
 0x5d8   :  { %v521_v54 = vsub.f32 %v460_v37, %v517_v53 }
 0x5da   :  { %v523_v55 = vmul.f32 1.442695, %v521_v54 }
 0x5db   :  { %v520_v56 = vpop.xlane.xlu1 %519 }
 0x5dc   :  { %3629 = vpow2.f32 %v523_v55  ;;  %v522_v57 = vsub.f32 %v510_v45, %v520_v56 }
 0x5de   :  { %v525_v58 = vmul.f32 1.442695, %v522_v57 }
 0x5df   :  { %v588_v59 = vpop.permute.xlu1 %587 }
 0x5e0   :  { %3631 = vpow2.f32 %v525_v58  ;;  %v593_v60 = vsel %vm321_vm3, %v588_v59, 0 }
 0x5e1   :  { %3332 = vmatpush3.bf16.msra.mxu0 %v593_v60 }
 0x5e2   :  { %3343 = vmatprep.subr.bf16.mxu0 %v3735_v15 }
 0x5e3   :  { %v735_v13 = vpop.permute.xlu1 %734 }
 0x5e4   :  { %v740_v27 = vsel %vm196_vm2, %v735_v13, 0 }
 0x5e7   :  { %v785_v14 = vpop.permute.xlu1 %784 }
 0x5e8   :  { %v790_v16 = vsel %vm196_vm2, %v785_v14, 0 }
 0x5e9   :  { %v3630_v61 = vpop.eup %3629 }
 0x5ea   :  { %v527_v62 = vsel %vm196_vm2, %v3630_v61, 0.0 }
 0x5eb   :  { %528 = vadd.xlane.f32.xlu0 %v527_v62  ;;  %v783_v17 = vpop.permute.xlu1 %782 }
 0x5ed   :  { %v3632_v63 = vpop.eup %3631 }
 0x5ee   :  { %v530_v0 = vsel %vm196_vm2, %v3632_v63, 0.0 }
 0x5ef   :  { %531 = vadd.xlane.f32.xlu0 %v530_v0 }
 0x605   :  { %539 = vrot.lane.b32.xlu0 %v3886_v38, %s3741_s22 }
 0x609   :  { %732 = vrot.lane.b32.xlu0 %v3886_v38, %s3743_s23 }
 0x674   :  { %v529_v1 = vpop.xlane.xlu0 %528 }
 0x675   :  { %3633 = vrcp.f32 %v529_v1 }
 0x678   :  { %v532_v2 = vpop.xlane.xlu0 %531 }
 0x679   :  { %3635 = vrcp.f32 %v532_v2 }
 0x67c   :  { %v540_v3 = vpop.permute.xlu0 %539 }
 0x67d   :  { %v545_v4 = vsel %vm321_vm3, %v540_v3, 0 }
 0x67e   :  { %3326 = vmatpush3.bf16.msra.mxu1 %v545_v4 }
 0x67f   :  { %3337 = vmatprep.subr.bf16.mxu1 %v3735_v15 }
 0x680   :  { %v733_v33 = vpop.permute.xlu0 %732 }
 0x682   :  { %v3634_v5 = vpop.eup %3633 }
 0x683   :  { %v535_v6 = vmul.f32 %v3634_v5, %v3630_v61 }
 0x685   :  { %v537_v7 = vpack.c.bf16 %v535_v6, %v535_v6 }
 0x686   :  { %v3636_v8 = vpop.eup %3635 }
 0x687   :  { %3328 = vmatmul.mubr.msk.bf16.vlgmr.msra.gmra.mxu1 %vm196_vm2, %v537_v7  ;;  %v536_v10 = vmul.f32 %v3636_v8, %v3632_v63 }
 0x688   :  { %3339 = vmatprep.mubr.msk.bf16.mxu1 %vm3736_vm1, %v3735_v15  ;;  %3338 = vmatpush3.bf16.msra.mxu1 %v642_v19 }
 0x689   :  { %v538_v11 = vpack.c.bf16 %v536_v10, %v536_v10  ;;  %3349 = vmatprep.subr.bf16.mxu1 %v3735_v15 }
 0x68b   :  { %3334 = vmatmul.mubr.msk.bf16.vlgmr.msra.gmra.mxu0 %vm196_vm2, %v538_v11 }
 0x68c   :  { %3344 = vmatpush3.bf16.msra.mxu0 %v689_v12  ;;  %3345 = vmatprep.mubr.msk.bf16.mxu0 %vm3736_vm1, %v3735_v15 }
 0x68d   :  { %3355 = vmatprep.subr.bf16.mxu0 %v3735_v15 }
 0x693   :  { %3346 = vmatmul.mubr.msk.bf16.vlgmr.msra.gmra.mxu0 %vm196_vm2, %v413_v30 }
 0x694   :  { %3356 = vmatpush3.bf16.xpose.msra.mxu0 %v790_v16  ;;  %3357 = vmatprep.mubr.msk.bf16.mxu0 %vm3736_vm1, %v3735_v15 }
 0x695   :  { %3367 = vmatprep.subr.bf16.mxu0 %v3735_v15 }
 0x69b   :  { %3358 = vmatmul.mubr.msk.bf16.vlgmr.msra.gmra.mxu0 %vm196_vm2, %v783_v17 }
 0x69c   :  { %3369 = vmatprep.mubr.msk.bf16.mxu0 %vm3736_vm1, %v3735_v15 }
 0x747   :  { %v581_v20 = vpop.f32.mrf.mxu1 }
 0x749   :  { %v3329_v21 = vpop.f32.mrf.mxu1 }
 0x74b   :  { %v584_v22 = vpop.f32.mrf.mxu1  ;;  %v629_v23 = vpop.f32.mrf.mxu0 }
 0x74c   :  { %v635_v24 = vpack.c.bf16 %v629_v23, %v581_v20  ;;  %v3082_v23 = vld [vmem:[%s4479_s6 + $0x8] sm:$0xf] }
 0x74d   :  { %v3330_v25 = vpop.f32.mrf.mxu1  ;;  %v3335_v26 = vpop.f32.mrf.mxu0 }
 0x74e   :  { %3340 = vmatmul.mubr.msk.bf16.vlgmr.msra.gmra.mxu1 %vm196_vm2, %v635_v24  ;;  %v959_v24 = vsel %vm321_vm3, %v3082_v23, 0 }
 0x74f   :  { %3350 = vmatpush3.bf16.xpose.msra.mxu1 %v740_v27  ;;  %v632_v28 = vpop.f32.mrf.mxu0  ;;  %3351 = vmatprep.mubr.msk.bf16.mxu1 %vm3736_vm1, %v3735_v15 }
 0x750   :  { %3361 = vmatprep.subr.bf16.mxu1 %v3735_v15 }
 0x751   :  { %v3336_v29 = vpop.f32.mrf.mxu0 }
 0x753   :  { %v4014_v30 = vpop.f32.mrf.mxu0 }
 0x755   :  { %v3347_v34 = vpop.f32.mrf.mxu0 }
 0x756   :  { %3352 = vmatmul.mubr.msk.bf16.vlgmr.msra.gmra.mxu1 %vm196_vm2, %v733_v33 }
 0x757   :  { %v4017_v35 = vpop.f32.mrf.mxu0  ;;  %3363 = vmatprep.mubr.msk.bf16.mxu1 %vm3736_vm1, %v3735_v15 }
 0x759   :  { %v3348_v36 = vpop.f32.mrf.mxu0 }
 0x75b   :  { %v826_v37 = vpop.f32.mrf.mxu0 }
 0x75c   :  { %v827_v39 = vadd.f32 %v3915_v51, %v826_v37 }
 0x75d   :  { %v3359_v40 = vpop.f32.mrf.mxu0 }
 0x75e   :  { %v835_v41 = vsel %vm196_vm2, %v827_v39, -inf }
 0x75f   :  { %836 = vmax.xlane.f32.xlu1 %v835_v41  ;;  %v829_v43 = vpop.f32.mrf.mxu0 }
 0x761   :  { %v3360_v44 = vpop.f32.mrf.mxu0 }
 0x770   :  { %904 = vrot.lane.b32.xlu1 %v3890_v42, %s3744_s28 }
 0x774   :  { %1006 = vrot.lane.b32.xlu1 %v3886_v38, %s4498_s29 }
 0x778   :  { %1056 = vrot.lane.b32.xlu1 %v3890_v42, %s4498_s29 }
 0x77c   :  { %1054 = vrot.lane.b32.xlu1 %v3890_v42, %s4496_s0 }
 0x7e8   :  { %v837_v45 = vpop.xlane.xlu1 %836 }
 0x7e9   :  { %v839_v49 = vsub.f32 %v827_v39, %v837_v45 }
 0x7eb   :  { %v842_v50 = vmul.f32 1.442695, %v839_v49 }
 0x7ec   :  { %v905_v46 = vpop.permute.xlu1 %904 }
 0x7ed   :  { %v910_v48 = vsel %vm321_vm3, %v905_v46, 0  ;;  %3637 = vpow2.f32 %v842_v50 }
 0x7ee   :  { %3368 = vmatpush3.bf16.msra.mxu0 %v910_v48 }
 0x7ef   :  { %3379 = vmatprep.subr.bf16.mxu0 %v3735_v15 }
 0x7f0   :  { %v1007_v8 = vpop.permute.xlu1 %1006 }
 0x7f1   :  { %v1012_v10 = vsel %vm196_vm2, %v1007_v8, 0 }
 0x7f4   :  { %v1057_v34 = vpop.permute.xlu1 %1056 }
 0x7f5   :  { %v1062_v40 = vsel %vm196_vm2, %v1057_v34, 0 }
 0x7f8   :  { %v1055_v43 = vpop.permute.xlu1 %1054 }
 0x7fa   :  { %v3638_v60 = vpop.eup %3637 }
 0x7fb   :  { %v847_v63 = vsel %vm196_vm2, %v3638_v60, 0.0 }
 0x80e   :  { %v4033_v52 = vpop.f32.mrf.mxu1 }
 0x80f   :  { %v726_v50 = vadd.f32 %v4014_v30, %v4033_v52 }
 0x810   :  { %v3341_v53 = vpop.f32.mrf.mxu1 }
 0x812   :  { %v4035_v54 = vpop.f32.mrf.mxu1 }
 0x814   :  { %v3342_v55 = vpop.f32.mrf.mxu1 }
 0x816   :  { %v776_v56 = vpop.f32.mrf.mxu1 }
 0x817   :  { %v777_v57 = vadd.f32 %v3909_v47, %v776_v56 }
 0x818   :  { %v3353_v58 = vpop.f32.mrf.mxu1 }
 0x819   :  { %v832_v59 = vsel %vm196_vm2, %v777_v57, -inf }
 0x81a   :  { %833 = vmax.xlane.f32.xlu0 %v832_v59  ;;  %v779_v61 = vpop.f32.mrf.mxu1 }
 0x81c   :  { %v3354_v62 = vpop.f32.mrf.mxu1 }
 0x81e   :  { %848 = vadd.xlane.f32.xlu0 %v847_v63 }
 0x8a3   :  { %v834_v0 = vpop.xlane.xlu0 %833 }
 0x8a4   :  { %v838_v1 = vsub.f32 %v777_v57, %v834_v0  ;;  %v729_v57 = vadd.f32 %v4017_v35, %v4035_v54 }
 0x8a6   :  { %v840_v2 = vmul.f32 1.442695, %v838_v1 }
 0x8a7   :  { %v849_v3 = vpop.xlane.xlu0 %848 }
 0x8a8   :  { %3639 = vpow2.f32 %v840_v2 }
 0x8a9   :  { %3641 = vrcp.f32 %v849_v3 }
 0x8b5   :  { %v3640_v4 = vpop.eup %3639 }
 0x8b6   :  { %v3642_v5 = vpop.eup %3641  ;;  %v844_v6 = vsel %vm196_vm2, %v3640_v4, 0.0 }
 0x8b7   :  { %845 = vadd.xlane.f32.xlu0 %v844_v6  ;;  %v853_v7 = vmul.f32 %v3642_v5, %v3638_v60 }
 0x8b9   :  { %v855_v9 = vpack.c.bf16 %v853_v7, %v853_v7 }
 0x8bb   :  { %3370 = vmatmul.mubr.msk.bf16.vlgmr.msra.gmra.mxu0 %vm196_vm2, %v855_v9 }
 0x8bc   :  { %3380 = vmatpush3.bf16.xpose.msra.mxu0 %v1012_v10  ;;  %3381 = vmatprep.mubr.msk.bf16.mxu0 %vm3736_vm1, %v3735_v15 }
 0x8bd   :  { %3391 = vmatprep.subr.bf16.mxu0 %v3735_v15 }
 0x8cd   :  { %856 = vrot.lane.b32.xlu0 %v3886_v38, %s3744_s28 }
 0x8d1   :  { %1004 = vrot.lane.b32.xlu0 %v3886_v38, %s4496_s0 }
 0x940   :  { %v846_v11 = vpop.xlane.xlu0 %845 }
 0x941   :  { %3643 = vrcp.f32 %v846_v11 }
 0x944   :  { %v857_v12 = vpop.permute.xlu0 %856 }
 0x945   :  { %v862_v13 = vsel %vm321_vm3, %v857_v12, 0 }
 0x946   :  { %3362 = vmatpush3.bf16.msra.mxu1 %v862_v13  ;;  %v3088_v13 = vld [vmem:[%s4479_s6 + $0xc] sm:$0xf] }
 0x947   :  { %3373 = vmatprep.subr.bf16.mxu1 %v3735_v15 }
 0x948   :  { %v1005_v14 = vpop.permute.xlu0 %1004 }
 0x949   :  { %3382 = vmatmul.mubr.msk.bf16.vlgmr.msra.gmra.mxu0 %vm196_vm2, %v1005_v14  ;;  %v1231_v14 = vsel %vm321_vm3, %v3088_v13, 0 }
 0x94a   :  { %3393 = vmatprep.mubr.msk.bf16.mxu0 %vm3736_vm1, %v3735_v15 }
 0x94e   :  { %v3644_v16 = vpop.eup %3643 }
 0x94f   :  { %v852_v17 = vmul.f32 %v3644_v16, %v3640_v4 }
 0x951   :  { %v854_v18 = vpack.c.bf16 %v852_v17, %v852_v17 }
 0x953   :  { %3364 = vmatmul.mubr.msk.bf16.vlgmr.msra.gmra.mxu1 %vm196_vm2, %v854_v18 }
 0x954   :  { %3375 = vmatprep.mubr.msk.bf16.mxu1 %vm3736_vm1, %v3735_v15  ;;  %3374 = vmatpush3.bf16.msra.mxu1 %v959_v24 }
 0x955   :  { %3385 = vmatprep.subr.bf16.mxu1 %v3735_v15 }
 0x97b   :  { %v946_v19 = vpop.f32.mrf.mxu0 }
 0x97d   :  { %v3371_v20 = vpop.f32.mrf.mxu0 }
 0x97f   :  { %v949_v21 = vpop.f32.mrf.mxu0 }
 0x981   :  { %v3372_v22 = vpop.f32.mrf.mxu0 }
 0xa09   :  { %v1048_v25 = vpop.f32.mrf.mxu0 }
 0xa0a   :  { %v1049_v26 = vadd.f32 %v3909_v47, %v1048_v25 }
 0xa0b   :  { %v3383_v27 = vpop.f32.mrf.mxu0 }
 0xa0c   :  { %v1104_v28 = vsel %vm196_vm2, %v1049_v26, -inf }
 0xa0d   :  { %1105 = vmax.xlane.f32.xlu0 %v1104_v28  ;;  %v1051_v29 = vpop.f32.mrf.mxu0 }
 0xa0f   :  { %v3384_v33 = vpop.f32.mrf.mxu0 }
 0xa13   :  { %v898_v36 = vpop.f32.mrf.mxu1 }
 0xa14   :  { %v952_v37 = vpack.c.bf16 %v946_v19, %v898_v36 }
 0xa15   :  { %v3365_v39 = vpop.f32.mrf.mxu1 }
 0xa16   :  { %3376 = vmatmul.mubr.msk.bf16.vlgmr.msra.gmra.mxu1 %vm196_vm2, %v952_v37 }
 0xa17   :  { %3386 = vmatpush3.bf16.xpose.msra.mxu1 %v1062_v40  ;;  %v901_v41 = vpop.f32.mrf.mxu1  ;;  %3387 = vmatprep.mubr.msk.bf16.mxu1 %vm3736_vm1, %v3735_v15 }
 0xa18   :  { %3397 = vmatprep.subr.bf16.mxu1 %v3735_v15 }
 0xa19   :  { %v3366_v47 = vpop.f32.mrf.mxu1 }
 0xa1e   :  { %3388 = vmatmul.mubr.msk.bf16.vlgmr.msra.gmra.mxu1 %vm196_vm2, %v1055_v43 }
 0xa1f   :  { %3399 = vmatprep.mubr.msk.bf16.mxu1 %vm3736_vm1, %v3735_v15 }
 0xa96   :  { %v1106_v44 = vpop.xlane.xlu0 %1105 }
 0xa97   :  { %v1110_v45 = vsub.f32 %v1049_v26, %v1106_v44  ;;  %v3090_v26 = vld [vmem:[%s4480_s7] ss:$0 sm:$0xff] }
 0xa99   :  { %v1112_v46 = vmul.f32 1.442695, %v1110_v45 }
 0xa9b   :  { %3645 = vpow2.f32 %v1112_v46 }
 0xaa8   :  { %v3646_v48 = vpop.eup %3645 }
 0xaa9   :  { %v1116_v49 = vsel %vm196_vm2, %v3646_v48, 0.0 }
 0xaaa   :  { %1117 = vadd.xlane.f32.xlu0 %v1116_v49 }
 0xad6   :  { %v995_v53 = vpop.f32.mrf.mxu1 }
 0xad7   :  { %v1002_v55 = vadd.f32 %v995_v53, %v726_v50 }
 0xad8   :  { %v3377_v56 = vpop.f32.mrf.mxu1 }
 0xad9   :  { %v3602_v56 = vld [vmem:[%s4483_s10] sm:$0xff]  }
 0xada   :  { %v998_v58 = vpop.f32.mrf.mxu1 }
 0xadb   :  { %v1003_v59 = vadd.f32 %v998_v58, %v729_v57 }
 0xadc   :  { %v3378_v60 = vpop.f32.mrf.mxu1 }
 0xade   :  { %v1098_v61 = vpop.f32.mrf.mxu1 }
 0xadf   :  { %v1099_v62 = vadd.f32 %v3915_v51, %v1098_v61 }
 0xae0   :  { %v3389_v63 = vpop.f32.mrf.mxu1 }
 0xae1   :  { %v1107_v0 = vsel %vm196_vm2, %v1099_v62, -inf }
 0xae2   :  { %1108 = vmax.xlane.f32.xlu1 %v1107_v0  ;;  %v1101_v1 = vpop.f32.mrf.mxu1 }
 0xae3   :  { %v3091_v1 = vld [vmem:[%s4481_s8] ss:$0 sm:$0xff] }
 0xae4   :  { %v3390_v2 = vpop.f32.mrf.mxu1 }
 0xaf3   :  { %1176 = vrot.lane.b32.xlu1 %v3890_v42, %s4494_s25 }
 0xb33   :  { %v1118_v5 = vpop.xlane.xlu0 %1117 }
 0xb6b   :  { %v1109_v30 = vpop.xlane.xlu1 %1108 }
 0xb6c   :  { %v1111_v52 = vsub.f32 %v1099_v62, %v1109_v30 }
 0xb6e   :  { %v1114_v3 = vmul.f32 1.442695, %v1111_v52 }
 0xb6f   :  { %v1177_v35 = vpop.permute.xlu1 %1176 }
 0xb70   :  { %3647 = vpow2.f32 %v1114_v3  ;;  %v1182_v54 = vsel %vm321_vm3, %v1177_v35, 0  ;;  %v3092_v3 = vld [vmem:[%s4482_s9] ss:$0 sm:$0xff] }
 0xb71   :  { %3398 = vmatpush3.bf16.msra.mxu1 %v1182_v54  ;;  %3649 = vrcp.f32 %v1118_v5  ;;  %v3603_v5 = vld [vmem:[%s4485_s12 + $0x18] sm:$0xff]  }
 0xb72   :  { %3409 = vmatprep.subr.bf16.mxu1 %v3735_v15 }
 0xb7d   :  { %v3648_v51 = vpop.eup %3647 }
 0xb7e   :  { %v1119_v4 = vsel %vm196_vm2, %v3648_v51, 0.0  ;;  %v3650_v42 = vpop.eup %3649 }
 0xb7f   :  { %1120 = vadd.xlane.f32.xlu0 %v1119_v4  ;;  %v1124_v7 = vmul.f32 %v3650_v42, %v3646_v48  ;;  %v3604_v42 = vld [vmem:[%s4485_s12 + $0x10] sm:$0xff]  }
 0xb81   :  { %v1126_v10 = vpack.c.bf16 %v1124_v7, %v1124_v7  ;;  %v3606_v7 = vld [vmem:[%s4485_s12] sm:$0xff]  }
 0xb95   :  { %1128 = vrot.lane.b32.xlu0 %v3886_v38, %s4494_s25 }
 0xc08   :  { %v1121_v6 = vpop.xlane.xlu0 %1120 }
 0xc09   :  { %3651 = vrcp.f32 %v1121_v6  ;;  %v3605_v6 = vld [vmem:[%s4485_s12 + $0x8] sm:$0xff]  }
 0xc0c   :  { %v1129_v8 = vpop.permute.xlu0 %1128 }
 0xc0d   :  { %v1134_v9 = vsel %vm321_vm3, %v1129_v8, 0  ;;  %v3093_v8 = vld [vmem:[%s4484_s11] ss:$0 sm:$0xff] }
 0xc0e   :  { %3392 = vmatpush3.bf16.msra.mxu0 %v1134_v9 }
 0xc0f   :  { %3403 = vmatprep.subr.bf16.mxu0 %v3735_v15 }
 0xc11   :  { %3394 = vmatmul.mubr.msk.bf16.vlgmr.msra.gmra.mxu0 %vm196_vm2, %v1126_v10 }
 0xc12   :  { %3405 = vmatprep.mubr.msk.bf16.mxu0 %vm3736_vm1, %v3735_v15  ;;  %3404 = vmatpush3.bf16.msra.mxu0 %v1231_v14 }
 0xc13   :  { %3417 = vmatprep.subr.bf16.mxu0 %v3735_v15 }
 0xc16   :  { %v3652_v11 = vpop.eup %3651 }
 0xc17   :  { %v1125_v38 = vmul.f32 %v3652_v11, %v3648_v51 }
 0xc19   :  { %v1127_v12 = vpack.c.bf16 %v1125_v38, %v1125_v38 }
 0xc1b   :  { %3400 = vmatmul.mubr.msk.bf16.vlgmr.msra.gmra.mxu1 %vm196_vm2, %v1127_v12 }
 0xc1c   :  { %3413 = vmatprep.mubr.msk.bf16.mxu1 %vm3736_vm1, %v3735_v15 }
 0xcd1   :  { %v1170_v16 = vpop.f32.mrf.mxu0 }
 0xcd3   :  { %v3395_v17 = vpop.f32.mrf.mxu0 }
 0xcd5   :  { %v1173_v18 = vpop.f32.mrf.mxu0 }
 0xcd7   :  { %v3396_v19 = vpop.f32.mrf.mxu0 }
 0xcdb   :  { %v1218_v20 = vpop.f32.mrf.mxu1 }
 0xcdc   :  { %v1224_v21 = vpack.c.bf16 %v1218_v20, %v1170_v16 }
 0xcdd   :  { %v3401_v22 = vpop.f32.mrf.mxu1 }
 0xcde   :  { %3406 = vmatmul.mubr.msk.bf16.vlgmr.msra.gmra.mxu0 %vm196_vm2, %v1224_v21 }
 0xcdf   :  { %v1221_v23 = vpop.f32.mrf.mxu1  ;;  %3425 = vmatprep.mubr.msk.bf16.mxu0 %vm3736_vm1, %v3735_v15  ;;  %3418 = vmatpush3.bf16.msra.mxu0 %v3603_v5 }
 0xce0   :  { %3419 = vmatprep.subr.bf16.mxu0 %v3735_v15 }
 0xce1   :  { %v3402_v24 = vpop.f32.mrf.mxu1 }
 0xce3   :  { %3420 = vmatpush3.bf16.msra.mxu0 %v3604_v42 }
 0xce4   :  { %3421 = vmatprep.subr.bf16.mxu0 %v3735_v15 }
 0xce7   :  { %3422 = vmatpush3.bf16.msra.mxu0 %v3605_v6 }
 0xce8   :  { %3423 = vmatprep.subr.bf16.mxu0 %v3735_v15 }
 0xceb   :  { %3424 = vmatpush3.bf16.msra.mxu0 %v3606_v7 }
 0xcec   :  { %3443 = vmatprep.subr.bf16.mxu0 %v3735_v15 }
 0xd9e   :  { %v1267_v25 = vpop.f32.mrf.mxu0 }
 0xd9f   :  { %v1274_v27 = vadd.f32 %v1267_v25, %v1002_v55 }
 0xda0   :  { %v3407_v28 = vpop.f32.mrf.mxu0 }
 0xda1   :  { %v1283_v29 = vadd.f32 %v3090_v26, %v1274_v27 }
 0xda2   :  { %v1270_v33 = vpop.f32.mrf.mxu0 }
 0xda3   :  { %v1275_v34 = vadd.f32 %v1270_v33, %v1003_v59  ;;  %v1285_v36 = vadd.f32 %v1283_v29, %v3874_v31 }
 0xda4   :  { %v3408_v37 = vpop.f32.mrf.mxu0 }
 0xda5   :  { %v1284_v39 = vadd.f32 %v3090_v26, %v1275_v34  ;;  %v1289_v40 = vsel %vm67_vm0, %v1285_v36, 0.0  ;;  %v3097_v26 = vld [vmem:[%s4486_s13] ss:$0 sm:$0xff] }
 0xda6   :  { %1290 = vadd.xlane.f32.xlu1 %v1289_v40 }
 0xda7   :  { %v1286_v41 = vadd.f32 %v1284_v39, %v3876_v32  ;;  %v3601_v32 = vld [vmem:[%s4483_s10 + $0x8] sm:$0xff]  }
 0xda8   :  { %3410 = vmatpush3.bf16.msra.mxu1 %v3601_v32  ;;  %v3608_v32 = vld [vmem:[%s4477_s4 + $0x10] sm:$0xff]  }
 0xda9   :  { %v1292_v47 = vsel %vm67_vm0, %v1286_v41, 0.0  ;;  %3411 = vmatprep.subr.bf16.mxu1 %v3735_v15 }
 0xdaa   :  { %1293 = vadd.xlane.f32.xlu0 %v1292_v47 }
 0xdac   :  { %3412 = vmatpush3.bf16.msra.mxu1 %v3602_v56 }
 0xdad   :  { %3429 = vmatprep.subr.bf16.mxu1 %v3735_v15 }
 0xe2f   :  { %v1291_v43 = vpop.xlane.xlu1 %1290 }
 0xe30   :  { %v1295_v44 = vmul.f32 0.03125, %v1291_v43 }
 0xe32   :  { %v1297_v45 = vsub.f32 %v1285_v36, %v1295_v44 }
 0xe33   :  { %v1294_v46 = vpop.xlane.xlu0 %1293 }
 0xe34   :  { %v1296_v48 = vmul.f32 0.03125, %v1294_v46  ;;  %v1299_v49 = vmul.f32 %v1297_v45, %v1297_v45 }
 0xe36   :  { %v1298_v50 = vsub.f32 %v1286_v41, %v1296_v48  ;;  %v1301_v53 = vsel %vm67_vm0, %v1299_v49, 0.0 }
 0xe37   :  { %1302 = vadd.xlane.f32.xlu0 %v1301_v53 }
 0xe38   :  { %v1300_v31 = vmul.f32 %v1298_v50, %v1298_v50 }
 0xe3a   :  { %v1304_v55 = vsel %vm67_vm0, %v1300_v31, 0.0 }
 0xe3b   :  { %1305 = vadd.xlane.f32.xlu1 %v1304_v55  ;;  %v3607_v55 = vld [vmem:[%s4477_s4 + $0x18] sm:$0xff]  }
 0xec0   :  { %v1303_v57 = vpop.xlane.xlu0 %1302 }
 0xec1   :  { %v1307_v58 = vmul.f32 0.03125, %v1303_v57 }
 0xec3   :  { %v1309_v59 = vadd.f32 1e-05, %v1307_v58 }
 0xec4   :  { %v1306_v60 = vpop.xlane.xlu1 %1305 }
 0xec5   :  { %3653 = vrsqrt.f32 %v1309_v59  ;;  %v1308_v61 = vmul.f32 0.03125, %v1306_v60 }
 0xec7   :  { %v1310_v62 = vadd.f32 1e-05, %v1308_v61 }
 0xec9   :  { %3655 = vrsqrt.f32 %v1310_v62 }
 0xed2   :  { %v3654_v63 = vpop.eup %3653 }
 0xed3   :  { %v1313_v0 = vmul.f32 %v3654_v63, %v1297_v45 }
 0xed5   :  { %v1321_v52 = vmul.f32 %v3091_v1, %v1313_v0  ;;  %v3103_v0 = vld [vmem:[%s4487_s14] ss:$0 sm:$0xff] }
 0xed6   :  { %v3656_v2 = vpop.eup %3655 }
 0xed7   :  { %v1314_v30 = vmul.f32 %v3656_v2, %v1298_v50  ;;  %v1329_v54 = vadd.f32 %v3092_v3, %v1321_v52  ;;  %v3104_v52 = vld [vmem:[%s4488_s15] ss:$0 sm:$0xff] }
 0xed9   :  { %v1322_v35 = vmul.f32 %v3091_v1, %v1314_v30 }
 0xedb   :  { %v1330_v51 = vadd.f32 %v3092_v3, %v1322_v35 }
 0xedd   :  { %v1335_v4 = vpack.c.bf16 %v1330_v51, %v1329_v54 }
 0xedf   :  { %3414 = vmatmul.mubr.msk.bf16.vlgmr.msra.gmra.mxu1 %vm67_vm0, %v1335_v4  ;;  %v3110_v4 = vld [vmem:[%s4478_s5 + $0x1] ss:$0 sm:$0xff] }
 0xee0   :  { %3433 = vmatprep.mubr.msk.bf16.mxu1 %vm3736_vm1, %v3735_v15  ;;  %3430 = vmatpush3.bf16.msra.mxu1 %v3607_v55 }
 0xee1   :  { %3431 = vmatprep.subr.bf16.mxu1 %v3735_v15 }
 0xee4   :  { %3432 = vmatpush3.bf16.msra.mxu1 %v3608_v32 }
 0xee5   :  { %3437 = vmatprep.subr.bf16.mxu1 %v3735_v15 }
 0xf9f   :  { %v1392_v9 = vpop.f32.mrf.mxu1 }
 0xfa0   :  { %v1393_v10 = vadd.f32 %v3093_v8, %v1392_v9 }
 0xfa1   :  { %v3415_v11 = vpop.f32.mrf.mxu1 }
 0xfa2   :  { %v1401_v38 = vmul.f32 0.70710677, %v1393_v10  ;;  %v1399_v20 = vmul.f32 0.5, %v1393_v10 }
 0xfa3   :  { %v1395_v12 = vpop.f32.mrf.mxu1 }
 0xfa4   :  { %3657 = verf.f32 %v1401_v38  ;;  %v1396_v13 = vadd.f32 %v3093_v8, %v1395_v12 }
 0xfa5   :  { %v3416_v14 = vpop.f32.mrf.mxu1 }
 0xfa6   :  { %v1402_v16 = vmul.f32 0.70710677, %v1396_v13  ;;  %v1400_v21 = vmul.f32 0.5, %v1396_v13 }
 0xfa8   :  { %3659 = verf.f32 %v1402_v16 }
 0xfb1   :  { %v3658_v17 = vpop.eup %3657 }
 0xfb2   :  { %v1405_v18 = vadd.f32 1.0, %v3658_v17  ;;  %v4207_v17 = vld [vmem:[%s4505_s30] ss:$0 sm:$0xff] }
 0xfb4   :  { %v1407_v23 = vmul.f32 %v1405_v18, %v1399_v20 }
 0xfb5   :  { %v3660_v19 = vpop.eup %3659 }
 0xfb6   :  { %v1406_v22 = vadd.f32 1.0, %v3660_v19 }
 0xfb8   :  { %v1408_v24 = vmul.f32 %v1406_v22, %v1400_v21 }
 0xfba   :  { %v1417_v25 = vpack.c.bf16 %v1408_v24, %v1407_v23  ;;  %v4214_v23 = vld [vmem:[%s4505_s30 + $0x1] ss:$0 sm:$0xff] }
 0xfbc   :  { %3426 = vmatmul.mubr.msk.bf16.vlgmr.msra.gmra.mxu0 %vm1449_vm4, %v1417_v25 }
 0xfbd   :  { %3445 = vmatprep.mubr.msk.bf16.mxu0 %vm3736_vm1, %v3735_v15 }
0x107c   :  { %v1487_v27 = vpop.f32.mrf.mxu0 }
0x107d   :  { %v1488_v28 = vadd.f32 %v3097_v26, %v1487_v27 }
0x107e   :  { %v3427_v29 = vpop.f32.mrf.mxu0 }
0x107f   :  { %v1494_v33 = vadd.f32 %v1488_v28, %v1329_v54 }
0x1080   :  { %v1490_v34 = vpop.f32.mrf.mxu0 }
0x1081   :  { %v1491_v36 = vadd.f32 %v3097_v26, %v1490_v34  ;;  %v1498_v37 = vsel %vm67_vm0, %v1494_v33, 0.0 }
0x1082   :  { %1499 = vadd.xlane.f32.xlu0 %v1498_v37  ;;  %v3428_v39 = vpop.f32.mrf.mxu0 }
0x1083   :  { %v1495_v40 = vadd.f32 %v1491_v36, %v1330_v51 }
0x1085   :  { %v1501_v41 = vsel %vm67_vm0, %v1495_v40, 0.0 }
0x1086   :  { %1502 = vadd.xlane.f32.xlu1 %v1501_v41 }
0x110b   :  { %v1500_v47 = vpop.xlane.xlu0 %1499 }
0x110c   :  { %v1504_v43 = vmul.f32 0.03125, %v1500_v47 }
0x110e   :  { %v1506_v44 = vsub.f32 %v1494_v33, %v1504_v43 }
0x110f   :  { %v1503_v45 = vpop.xlane.xlu1 %1502 }
0x1110   :  { %v1505_v46 = vmul.f32 0.03125, %v1503_v45  ;;  %v1508_v48 = vmul.f32 %v1506_v44, %v1506_v44 }
0x1112   :  { %v1507_v49 = vsub.f32 %v1495_v40, %v1505_v46  ;;  %v1510_v50 = vsel %vm67_vm0, %v1508_v48, 0.0 }
0x1113   :  { %1511 = vadd.xlane.f32.xlu0 %v1510_v50 }
0x1114   :  { %v1509_v53 = vmul.f32 %v1507_v49, %v1507_v49 }
0x1116   :  { %v1513_v31 = vsel %vm67_vm0, %v1509_v53, 0.0 }
0x1117   :  { %1514 = vadd.xlane.f32.xlu1 %v1513_v31 }
0x119c   :  { %v1512_v56 = vpop.xlane.xlu0 %1511 }
0x119d   :  { %v1516_v57 = vmul.f32 0.03125, %v1512_v56 }
0x119f   :  { %v1518_v58 = vadd.f32 1e-05, %v1516_v57 }
0x11a0   :  { %v1515_v59 = vpop.xlane.xlu1 %1514 }
0x11a1   :  { %3661 = vrsqrt.f32 %v1518_v58  ;;  %v1517_v60 = vmul.f32 0.03125, %v1515_v59 }
0x11a3   :  { %v1519_v61 = vadd.f32 1e-05, %v1517_v60 }
0x11a5   :  { %3663 = vrsqrt.f32 %v1519_v61 }
0x11ae   :  { %v3662_v62 = vpop.eup %3661 }
0x11af   :  { %v1522_v63 = vmul.f32 %v3662_v62, %v1506_v44 }
0x11b1   :  { %v1530_v30 = vmul.f32 %v3103_v0, %v1522_v63 }
0x11b2   :  { %v3664_v1 = vpop.eup %3663 }
0x11b3   :  { %v1523_v2 = vmul.f32 %v3664_v1, %v1507_v49  ;;  %v4172_v35 = vadd.f32 %v3104_v52, %v1530_v30 }
0x11b5   :  { %v1531_v3 = vmul.f32 %v3103_v0, %v1523_v2 }
0x11b7   :  { %v4174_v54 = vadd.f32 %v3104_v52, %v1531_v3 }
0x11b9   :  { %v1545_v51 = vpack.c.bf16 %v4174_v54, %v4172_v35 }
0x11bb   :  { %3434 = vmatmul.mubr.msk.bf16.vlgmr.msra.gmra.mxu1 %vm67_vm0, %v1545_v51 }
0x11bc   :  { %3439 = vmatprep.mubr.msk.bf16.mxu1 %vm3736_vm1, %v3735_v15 }
0x127b   :  { %v1603_v5 = vpop.f32.mrf.mxu1 }
0x127c   :  { %v1604_v42 = vadd.f32 %v3110_v4, %v1603_v5 }
0x127d   :  { %v3435_v6 = vpop.f32.mrf.mxu1 }
0x127e   :  { %v4184_v7 = vpack.c.bf16 %v1604_v42, %v1604_v42 }
0x127f   :  { %v1606_v8 = vpop.f32.mrf.mxu1 }
0x1280   :  { %v1607_v9 = vadd.f32 %v3110_v4, %v1606_v8  ;;  %1613 = vrot.lane.b32.xlu0 %v4184_v7, %s3737_s3 }
0x1281   :  { %v3436_v10 = vpop.f32.mrf.mxu1 }
0x1282   :  { %v4188_v11 = vpack.c.bf16 %v1607_v9, %v1607_v9 }
0x1284   :  { %1662 = vrot.lane.b32.xlu1 %v4188_v11, %s3737_s3 }
0x12f2   :  { %v1614_v38 = vpop.permute.xlu0 %1613 }
0x12f3   :  { %v1619_v12 = vsel %vm196_vm2, %v1614_v38, 0 }
0x12f4   :  { %3438 = vmatpush3.bf16.xpose.msra.mxu1 %v1619_v12 }
0x12f5   :  { %3449 = vmatprep.subr.bf16.mxu1 %v3735_v15 }
0x12f6   :  { %v1663_v13 = vpop.permute.xlu1 %1662 }
0x12f7   :  { %v1668_v14 = vsel %vm196_vm2, %v1663_v13, 0 }
0x12f8   :  { %3444 = vmatpush3.bf16.xpose.msra.mxu0 %v1668_v14 }
0x12f9   :  { %3455 = vmatprep.subr.bf16.mxu0 %v3735_v15 }
0x12fb   :  { %3440 = vmatmul.mubr.msk.bf16.vlgmr.msra.gmra.mxu1 %vm196_vm2, %v4184_v7 }
0x12fc   :  { %3451 = vmatprep.mubr.msk.bf16.mxu1 %vm3736_vm1, %v3735_v15 }
0x12ff   :  { %3446 = vmatmul.mubr.msk.bf16.vlgmr.msra.gmra.mxu0 %vm196_vm2, %v4188_v11 }
0x1300   :  { %3457 = vmatprep.mubr.msk.bf16.mxu0 %vm3736_vm1, %v3735_v15 }
0x13bb   :  { %v1655_v16 = vpop.f32.mrf.mxu1 }
0x13bc   :  { %v1656_v18 = vadd.f32 %v4207_v17, %v1655_v16 }
0x13bd   :  { %v3441_v19 = vpop.f32.mrf.mxu1 }
0x13be   :  { %v1710_v20 = vsel %vm196_vm2, %v1656_v18, -inf }
0x13bf   :  { %1711 = vmax.xlane.f32.xlu1 %v1710_v20  ;;  %v1658_v21 = vpop.f32.mrf.mxu1  ;;  %v1704_v22 = vpop.f32.mrf.mxu0 }
0x13c0   :  { %v1705_v24 = vadd.f32 %v4214_v23, %v1704_v22 }
0x13c1   :  { %v3442_v25 = vpop.f32.mrf.mxu1  ;;  %v3447_v26 = vpop.f32.mrf.mxu0 }
0x13c2   :  { %v1713_v27 = vsel %vm196_vm2, %v1705_v24, -inf }
0x13c3   :  { %1714 = vmax.xlane.f32.xlu0 %v1713_v27  ;;  %v1707_v28 = vpop.f32.mrf.mxu0 }
0x13c5   :  { %v3448_v29 = vpop.f32.mrf.mxu0 }
0x13d0   :  { %1782 = vrot.lane.b32.xlu1 %v4188_v11, %s3738_s1 }
0x13d4   :  { %1835 = vrot.lane.b32.xlu1 %v4184_v7, %s3739_s20 }
0x1448   :  { %v1712_v33 = vpop.xlane.xlu1 %1711 }
0x1449   :  { %v1716_v34 = vsub.f32 %v1656_v18, %v1712_v33 }
0x144b   :  { %v1718_v36 = vmul.f32 1.442695, %v1716_v34 }
0x144c   :  { %v1783_v37 = vpop.permute.xlu1 %1782  ;;  %v1715_v39 = vpop.xlane.xlu0 %1714 }
0x144d   :  { %3665 = vpow2.f32 %v1718_v36  ;;  %v1788_v40 = vsel %vm321_vm3, %v1783_v37, 0  ;;  %v1717_v41 = vsub.f32 %v1705_v24, %v1715_v39 }
0x144e   :  { %3456 = vmatpush3.bf16.msra.mxu0 %v1788_v40 }
0x144f   :  { %v1720_v47 = vmul.f32 1.442695, %v1717_v41  ;;  %3467 = vmatprep.subr.bf16.mxu0 %v3735_v15 }
0x1450   :  { %v1836_v48 = vpop.permute.xlu1 %1835 }
0x1451   :  { %3667 = vpow2.f32 %v1720_v47  ;;  %v1841_v58 = vsel %vm196_vm2, %v1836_v48, 0  ;;  %v3118_v48 = vld [vmem:[%s4479_s6 + $0x10] sm:$0xf] }
0x145a   :  { %v3666_v43 = vpop.eup %3665 }
0x145b   :  { %v1722_v44 = vsel %vm196_vm2, %v3666_v43, 0.0 }
0x145c   :  { %1723 = vadd.xlane.f32.xlu0 %v1722_v44 }
0x145e   :  { %v3668_v45 = vpop.eup %3667 }
0x145f   :  { %v1725_v46 = vsel %vm196_vm2, %v3668_v45, 0.0 }
0x1460   :  { %1726 = vadd.xlane.f32.xlu1 %v1725_v46 }
0x1471   :  { %1885 = vrot.lane.b32.xlu1 %v4188_v11, %s3739_s20 }
0x1472   :  { %1734 = vrot.lane.b32.xlu0 %v4184_v7, %s3738_s1 }
0x1475   :  { %1883 = vrot.lane.b32.xlu1 %v4188_v11, %s3740_s21 }
0x1476   :  { %1833 = vrot.lane.b32.xlu0 %v4184_v7, %s3740_s21 }
0x14e5   :  { %v1724_v49 = vpop.xlane.xlu0 %1723 }
0x14e6   :  { %3669 = vrcp.f32 %v1724_v49 }
0x14e9   :  { %v1727_v50 = vpop.xlane.xlu1 %1726  ;;  %v1735_v53 = vpop.permute.xlu0 %1734 }
0x14ea   :  { %3671 = vrcp.f32 %v1727_v50  ;;  %v1740_v31 = vsel %vm321_vm3, %v1735_v53, 0  ;;  %v2107_v53 = vsel %vm321_vm3, %v3118_v48, 0 }
0x14eb   :  { %3450 = vmatpush3.bf16.msra.mxu1 %v1740_v31 }
0x14ec   :  { %3461 = vmatprep.subr.bf16.mxu1 %v3735_v15 }
0x14ed   :  { %v1886_v60 = vpop.permute.xlu1 %1885  ;;  %v1834_v63 = vpop.permute.xlu0 %1833 }
0x14ee   :  { %v1891_v62 = vsel %vm196_vm2, %v1886_v60, 0 }
0x14f1   :  { %v1884_v0 = vpop.permute.xlu1 %1883 }
0x14f3   :  { %v3670_v55 = vpop.eup %3669 }
0x14f4   :  { %v1730_v32 = vmul.f32 %v3670_v55, %v3666_v43 }
0x14f6   :  { %v1732_v56 = vpack.c.bf16 %v1730_v32, %v1730_v32 }
0x14f7   :  { %v3672_v57 = vpop.eup %3671 }
0x14f8   :  { %3452 = vmatmul.mubr.msk.bf16.vlgmr.msra.gmra.mxu1 %vm196_vm2, %v1732_v56  ;;  %v1731_v59 = vmul.f32 %v3672_v57, %v3668_v45  ;;  %v3123_v57 = vld [vmem:[%s4479_s6 + $0x14] sm:$0xf] }
0x14f9   :  { %3462 = vmatpush3.bf16.xpose.msra.mxu1 %v1841_v58  ;;  %3463 = vmatprep.mubr.msk.bf16.mxu1 %vm3736_vm1, %v3735_v15  ;;  %v2060_v58 = vsel %vm321_vm3, %v3123_v57, 0 }
0x14fa   :  { %v1733_v61 = vpack.c.bf16 %v1731_v59, %v1731_v59  ;;  %3473 = vmatprep.subr.bf16.mxu1 %v3735_v15 }
0x14fc   :  { %3458 = vmatmul.mubr.msk.bf16.vlgmr.msra.gmra.mxu0 %vm196_vm2, %v1733_v61 }
0x14fd   :  { %3468 = vmatpush3.bf16.xpose.msra.mxu0 %v1891_v62  ;;  %3469 = vmatprep.mubr.msk.bf16.mxu0 %vm3736_vm1, %v3735_v15 }
0x14fe   :  { %3479 = vmatprep.subr.bf16.mxu0 %v3735_v15 }
0x1500   :  { %3464 = vmatmul.mubr.msk.bf16.vlgmr.msra.gmra.mxu1 %vm196_vm2, %v1834_v63 }
0x1501   :  { %3475 = vmatprep.mubr.msk.bf16.mxu1 %vm3736_vm1, %v3735_v15 }
0x1504   :  { %3470 = vmatmul.mubr.msk.bf16.vlgmr.msra.gmra.mxu0 %vm196_vm2, %v1884_v0 }
0x1505   :  { %3481 = vmatprep.mubr.msk.bf16.mxu0 %vm3736_vm1, %v3735_v15 }
0x15b8   :  { %v4252_v1 = vpop.f32.mrf.mxu1 }
0x15ba   :  { %v3453_v2 = vpop.f32.mrf.mxu1 }
0x15bc   :  { %v1779_v30 = vpop.f32.mrf.mxu1  ;;  %v4254_v52 = vpop.f32.mrf.mxu0 }
0x15bd   :  { %v1830_v3 = vpack.c.bf16 %v4254_v52, %v4252_v1 }
0x15be   :  { %v3454_v51 = vpop.f32.mrf.mxu1  ;;  %v3459_v4 = vpop.f32.mrf.mxu0 }
0x15c0   :  { %v1827_v5 = vpop.f32.mrf.mxu0  ;;  %v1877_v42 = vpop.f32.mrf.mxu1 }
0x15c1   :  { %v1878_v6 = vadd.f32 %v4207_v17, %v1877_v42 }
0x15c2   :  { %v3460_v8 = vpop.f32.mrf.mxu0  ;;  %v3465_v9 = vpop.f32.mrf.mxu1 }
0x15c3   :  { %v1933_v10 = vsel %vm196_vm2, %v1878_v6, -inf }
0x15c4   :  { %1934 = vmax.xlane.f32.xlu0 %v1933_v10  ;;  %v1880_v38 = vpop.f32.mrf.mxu1  ;;  %v1927_v12 = vpop.f32.mrf.mxu0 }
0x15c5   :  { %v1928_v13 = vadd.f32 %v4214_v23, %v1927_v12 }
0x15c6   :  { %v3466_v14 = vpop.f32.mrf.mxu1  ;;  %v3471_v16 = vpop.f32.mrf.mxu0 }
0x15c7   :  { %v1936_v18 = vsel %vm196_vm2, %v1928_v13, -inf }
0x15c8   :  { %1937 = vmax.xlane.f32.xlu1 %v1936_v18  ;;  %v1930_v19 = vpop.f32.mrf.mxu0 }
0x15ca   :  { %v3472_v20 = vpop.f32.mrf.mxu0 }
0x15d9   :  { %2005 = vrot.lane.b32.xlu1 %v4188_v11, %s3741_s22 }
0x15dd   :  { %2152 = vrot.lane.b32.xlu1 %v4184_v7, %s3742_s2 }
0x15e1   :  { %2202 = vrot.lane.b32.xlu1 %v4188_v11, %s3742_s2  ;;  %s4507_s2 = smov 104  }
0x15e5   :  { %2200 = vrot.lane.b32.xlu1 %v4188_v11, %s3743_s23 }
0x164d   :  { %v1935_v21 = vpop.xlane.xlu0 %1934 }
0x164e   :  { %v1939_v22 = vsub.f32 %v1878_v6, %v1935_v21 }
0x1650   :  { %v1941_v24 = vmul.f32 1.442695, %v1939_v22 }
0x1651   :  { %v1938_v25 = vpop.xlane.xlu1 %1937 }
0x1652   :  { %3673 = vpow2.f32 %v1941_v24  ;;  %v1940_v26 = vsub.f32 %v1928_v13, %v1938_v25 }
0x1654   :  { %v1943_v27 = vmul.f32 1.442695, %v1940_v26 }
0x1655   :  { %v2006_v28 = vpop.permute.xlu1 %2005 }
0x1656   :  { %3675 = vpow2.f32 %v1943_v27  ;;  %v2011_v29 = vsel %vm321_vm3, %v2006_v28, 0 }
0x1657   :  { %3480 = vmatpush3.bf16.msra.mxu0 %v2011_v29 }
0x1658   :  { %3491 = vmatprep.subr.bf16.mxu0 %v3735_v15 }
0x1659   :  { %v2153_v31 = vpop.permute.xlu1 %2152 }
0x165a   :  { %v2158_v2 = vsel %vm196_vm2, %v2153_v31, 0 }
0x165d   :  { %v2203_v55 = vpop.permute.xlu1 %2202 }
0x165e   :  { %v2208_v32 = vsel %vm196_vm2, %v2203_v55, 0 }
0x165f   :  { %v3674_v33 = vpop.eup %3673 }
0x1660   :  { %v1945_v34 = vsel %vm196_vm2, %v3674_v33, 0.0 }
0x1661   :  { %1946 = vadd.xlane.f32.xlu0 %v1945_v34  ;;  %v2201_v56 = vpop.permute.xlu1 %2200 }
0x1663   :  { %v3676_v36 = vpop.eup %3675 }
0x1664   :  { %v1948_v37 = vsel %vm196_vm2, %v3676_v36, 0.0 }
0x1665   :  { %1949 = vadd.xlane.f32.xlu0 %v1948_v37 }
0x167b   :  { %1957 = vrot.lane.b32.xlu0 %v4184_v7, %s3741_s22  ;;  %s4506_s22 = smov 72  }
0x167f   :  { %2150 = vrot.lane.b32.xlu0 %v4184_v7, %s3743_s23 }
0x16ea   :  { %v1947_v39 = vpop.xlane.xlu0 %1946 }
0x16eb   :  { %3677 = vrcp.f32 %v1947_v39 }
0x16ee   :  { %v1950_v40 = vpop.xlane.xlu0 %1949 }
0x16ef   :  { %3679 = vrcp.f32 %v1950_v40 }
0x16f2   :  { %v1958_v41 = vpop.permute.xlu0 %1957 }
0x16f3   :  { %v1963_v47 = vsel %vm321_vm3, %v1958_v41, 0 }
0x16f4   :  { %3474 = vmatpush3.bf16.msra.mxu1 %v1963_v47 }
0x16f5   :  { %3485 = vmatprep.subr.bf16.mxu1 %v3735_v15 }
0x16f6   :  { %v2151_v51 = vpop.permute.xlu0 %2150 }
0x16f8   :  { %v3678_v43 = vpop.eup %3677 }
0x16f9   :  { %v1953_v44 = vmul.f32 %v3678_v43, %v3674_v33 }
0x16fb   :  { %v1955_v45 = vpack.c.bf16 %v1953_v44, %v1953_v44 }
0x16fc   :  { %v3680_v46 = vpop.eup %3679 }
0x16fd   :  { %3476 = vmatmul.mubr.msk.bf16.vlgmr.msra.gmra.mxu1 %vm196_vm2, %v1955_v45  ;;  %v1954_v49 = vmul.f32 %v3680_v46, %v3676_v36 }
0x16fe   :  { %3487 = vmatprep.mubr.msk.bf16.mxu1 %vm3736_vm1, %v3735_v15  ;;  %3486 = vmatpush3.bf16.msra.mxu1 %v2060_v58 }
0x16ff   :  { %v1956_v50 = vpack.c.bf16 %v1954_v49, %v1954_v49  ;;  %3497 = vmatprep.subr.bf16.mxu1 %v3735_v15 }
0x1701   :  { %3482 = vmatmul.mubr.msk.bf16.vlgmr.msra.gmra.mxu0 %vm196_vm2, %v1956_v50 }
0x1702   :  { %3492 = vmatpush3.bf16.msra.mxu0 %v2107_v53  ;;  %3493 = vmatprep.mubr.msk.bf16.mxu0 %vm3736_vm1, %v3735_v15 }
0x1703   :  { %3503 = vmatprep.subr.bf16.mxu0 %v3735_v15 }
0x1709   :  { %3494 = vmatmul.mubr.msk.bf16.vlgmr.msra.gmra.mxu0 %vm196_vm2, %v1830_v3 }
0x170a   :  { %3504 = vmatpush3.bf16.xpose.msra.mxu0 %v2208_v32  ;;  %3505 = vmatprep.mubr.msk.bf16.mxu0 %vm3736_vm1, %v3735_v15 }
0x170b   :  { %3515 = vmatprep.subr.bf16.mxu0 %v3735_v15 }
0x1711   :  { %3506 = vmatmul.mubr.msk.bf16.vlgmr.msra.gmra.mxu0 %vm196_vm2, %v2201_v56 }
0x1712   :  { %3517 = vmatprep.mubr.msk.bf16.mxu0 %vm3736_vm1, %v3735_v15 }
0x17bd   :  { %v1999_v59 = vpop.f32.mrf.mxu1 }
0x17bf   :  { %v3477_v60 = vpop.f32.mrf.mxu1 }
0x17c1   :  { %v2002_v61 = vpop.f32.mrf.mxu1  ;;  %v2047_v62 = vpop.f32.mrf.mxu0 }
0x17c2   :  { %v2053_v63 = vpack.c.bf16 %v2047_v62, %v1999_v59  ;;  %v3130_v62 = vld [vmem:[%s4479_s6 + $0x18] sm:$0xf] }
0x17c3   :  { %v3478_v0 = vpop.f32.mrf.mxu1  ;;  %v3483_v1 = vpop.f32.mrf.mxu0 }
0x17c4   :  { %3488 = vmatmul.mubr.msk.bf16.vlgmr.msra.gmra.mxu1 %vm196_vm2, %v2053_v63  ;;  %v2377_v63 = vsel %vm321_vm3, %v3130_v62, 0 }
0x17c5   :  { %3498 = vmatpush3.bf16.xpose.msra.mxu1 %v2158_v2  ;;  %v2050_v30 = vpop.f32.mrf.mxu0  ;;  %3499 = vmatprep.mubr.msk.bf16.mxu1 %vm3736_vm1, %v3735_v15 }
0x17c6   :  { %3509 = vmatprep.subr.bf16.mxu1 %v3735_v15 }
0x17c7   :  { %v3484_v52 = vpop.f32.mrf.mxu0 }
0x17c9   :  { %v4312_v3 = vpop.f32.mrf.mxu0 }
0x17cb   :  { %v3495_v4 = vpop.f32.mrf.mxu0 }
0x17cc   :  { %3500 = vmatmul.mubr.msk.bf16.vlgmr.msra.gmra.mxu1 %vm196_vm2, %v2151_v51 }
0x17cd   :  { %v4315_v5 = vpop.f32.mrf.mxu0  ;;  %3511 = vmatprep.mubr.msk.bf16.mxu1 %vm3736_vm1, %v3735_v15 }
0x17cf   :  { %v3496_v42 = vpop.f32.mrf.mxu0 }
0x17d1   :  { %v2244_v6 = vpop.f32.mrf.mxu0 }
0x17d2   :  { %v2245_v8 = vadd.f32 %v4214_v23, %v2244_v6 }
0x17d3   :  { %v3507_v9 = vpop.f32.mrf.mxu0 }
0x17d4   :  { %v2253_v10 = vsel %vm196_vm2, %v2245_v8, -inf }
0x17d5   :  { %2254 = vmax.xlane.f32.xlu1 %v2253_v10  ;;  %v2247_v38 = vpop.f32.mrf.mxu0 }
0x17d7   :  { %v3508_v12 = vpop.f32.mrf.mxu0 }
0x17e6   :  { %2322 = vrot.lane.b32.xlu1 %v4188_v11, %s3744_s28 }
0x17ea   :  { %2424 = vrot.lane.b32.xlu1 %v4184_v7, %s4506_s22 }
0x17ee   :  { %2474 = vrot.lane.b32.xlu1 %v4188_v11, %s4506_s22 }
0x17f2   :  { %2472 = vrot.lane.b32.xlu1 %v4188_v11, %s4507_s2 }
0x185e   :  { %v2255_v13 = vpop.xlane.xlu1 %2254 }
0x185f   :  { %v2257_v18 = vsub.f32 %v2245_v8, %v2255_v13 }
0x1861   :  { %v2260_v19 = vmul.f32 1.442695, %v2257_v18 }
0x1862   :  { %v2323_v14 = vpop.permute.xlu1 %2322 }
0x1863   :  { %v2328_v16 = vsel %vm321_vm3, %v2323_v14, 0  ;;  %3681 = vpow2.f32 %v2260_v19 }
0x1864   :  { %3516 = vmatpush3.bf16.msra.mxu0 %v2328_v16 }
0x1865   :  { %3527 = vmatprep.subr.bf16.mxu0 %v3735_v15 }
0x1866   :  { %v2425_v46 = vpop.permute.xlu1 %2424 }
0x1867   :  { %v2430_v49 = vsel %vm196_vm2, %v2425_v46, 0 }
0x186a   :  { %v2475_v4 = vpop.permute.xlu1 %2474 }
0x186b   :  { %v2480_v9 = vsel %vm196_vm2, %v2475_v4, 0 }
0x186e   :  { %v2473_v38 = vpop.permute.xlu1 %2472 }
0x1870   :  { %v3682_v29 = vpop.eup %3681 }
0x1871   :  { %v2265_v36 = vsel %vm196_vm2, %v3682_v29, 0.0 }
0x1884   :  { %v4331_v20 = vpop.f32.mrf.mxu1 }
0x1885   :  { %v2144_v19 = vadd.f32 %v4312_v3, %v4331_v20 }
0x1886   :  { %v3489_v21 = vpop.f32.mrf.mxu1 }
0x1888   :  { %v4333_v22 = vpop.f32.mrf.mxu1 }
0x188a   :  { %v3490_v24 = vpop.f32.mrf.mxu1 }
0x188c   :  { %v2194_v25 = vpop.f32.mrf.mxu1 }
0x188d   :  { %v2195_v26 = vadd.f32 %v4207_v17, %v2194_v25 }
0x188e   :  { %v3501_v27 = vpop.f32.mrf.mxu1 }
0x188f   :  { %v2250_v28 = vsel %vm196_vm2, %v2195_v26, -inf }
0x1890   :  { %2251 = vmax.xlane.f32.xlu0 %v2250_v28  ;;  %v2197_v33 = vpop.f32.mrf.mxu1 }
0x1892   :  { %v3502_v34 = vpop.f32.mrf.mxu1 }
0x1894   :  { %2266 = vadd.xlane.f32.xlu0 %v2265_v36 }
0x1919   :  { %v2252_v37 = vpop.xlane.xlu0 %2251 }
0x191a   :  { %v2256_v39 = vsub.f32 %v2195_v26, %v2252_v37  ;;  %v2147_v26 = vadd.f32 %v4315_v5, %v4333_v22 }
0x191c   :  { %v2258_v40 = vmul.f32 1.442695, %v2256_v39 }
0x191d   :  { %v2267_v41 = vpop.xlane.xlu0 %2266 }
0x191e   :  { %3683 = vpow2.f32 %v2258_v40 }
0x191f   :  { %3685 = vrcp.f32 %v2267_v41 }
0x192b   :  { %v3684_v47 = vpop.eup %3683 }
0x192c   :  { %v3686_v43 = vpop.eup %3685  ;;  %v2262_v44 = vsel %vm196_vm2, %v3684_v47, 0.0 }
0x192d   :  { %2263 = vadd.xlane.f32.xlu0 %v2262_v44  ;;  %v2271_v45 = vmul.f32 %v3686_v43, %v3682_v29 }
0x192f   :  { %v2273_v48 = vpack.c.bf16 %v2271_v45, %v2271_v45 }
0x1931   :  { %3518 = vmatmul.mubr.msk.bf16.vlgmr.msra.gmra.mxu0 %vm196_vm2, %v2273_v48 }
0x1932   :  { %3528 = vmatpush3.bf16.xpose.msra.mxu0 %v2430_v49  ;;  %3529 = vmatprep.mubr.msk.bf16.mxu0 %vm3736_vm1, %v3735_v15 }
0x1933   :  { %3539 = vmatprep.subr.bf16.mxu0 %v3735_v15 }
0x1943   :  { %2274 = vrot.lane.b32.xlu0 %v4184_v7, %s3744_s28 }
0x1947   :  { %2422 = vrot.lane.b32.xlu0 %v4184_v7, %s4507_s2 }
0x19b6   :  { %v2264_v50 = vpop.xlane.xlu0 %2263 }
0x19b7   :  { %3687 = vrcp.f32 %v2264_v50 }
0x19ba   :  { %v2275_v53 = vpop.permute.xlu0 %2274 }
0x19bb   :  { %v2280_v31 = vsel %vm321_vm3, %v2275_v53, 0 }
0x19bc   :  { %3510 = vmatpush3.bf16.msra.mxu1 %v2280_v31  ;;  %v3136_v31 = vld [vmem:[%s4479_s6 + $0x1c] sm:$0xf] }
0x19bd   :  { %3521 = vmatprep.subr.bf16.mxu1 %v3735_v15 }
0x19be   :  { %v2423_v55 = vpop.permute.xlu0 %2422 }
0x19bf   :  { %3530 = vmatmul.mubr.msk.bf16.vlgmr.msra.gmra.mxu0 %vm196_vm2, %v2423_v55  ;;  %v2649_v55 = vsel %vm321_vm3, %v3136_v31, 0 }
0x19c0   :  { %3541 = vmatprep.mubr.msk.bf16.mxu0 %vm3736_vm1, %v3735_v15 }
0x19c4   :  { %v3688_v32 = vpop.eup %3687 }
0x19c5   :  { %v2270_v56 = vmul.f32 %v3688_v32, %v3684_v47 }
0x19c7   :  { %v2272_v57 = vpack.c.bf16 %v2270_v56, %v2270_v56 }
0x19c9   :  { %3512 = vmatmul.mubr.msk.bf16.vlgmr.msra.gmra.mxu1 %vm196_vm2, %v2272_v57 }
0x19ca   :  { %3523 = vmatprep.mubr.msk.bf16.mxu1 %vm3736_vm1, %v3735_v15  ;;  %3522 = vmatpush3.bf16.msra.mxu1 %v2377_v63 }
0x19cb   :  { %3533 = vmatprep.subr.bf16.mxu1 %v3735_v15 }
0x19f1   :  { %v2364_v58 = vpop.f32.mrf.mxu0 }
0x19f3   :  { %v3519_v59 = vpop.f32.mrf.mxu0 }
0x19f5   :  { %v2367_v60 = vpop.f32.mrf.mxu0 }
0x19f7   :  { %v3520_v61 = vpop.f32.mrf.mxu0 }
0x1a7f   :  { %v2466_v0 = vpop.f32.mrf.mxu0 }
0x1a80   :  { %v2467_v1 = vadd.f32 %v4207_v17, %v2466_v0 }
0x1a81   :  { %v3531_v2 = vpop.f32.mrf.mxu0 }
0x1a82   :  { %v2522_v30 = vsel %vm196_vm2, %v2467_v1, -inf }
0x1a83   :  { %2523 = vmax.xlane.f32.xlu0 %v2522_v30  ;;  %v2469_v52 = vpop.f32.mrf.mxu0 }
0x1a85   :  { %v3532_v51 = vpop.f32.mrf.mxu0 }
0x1a89   :  { %v2316_v42 = vpop.f32.mrf.mxu1 }
0x1a8a   :  { %v2370_v6 = vpack.c.bf16 %v2364_v58, %v2316_v42 }
0x1a8b   :  { %v3513_v8 = vpop.f32.mrf.mxu1 }
0x1a8c   :  { %3524 = vmatmul.mubr.msk.bf16.vlgmr.msra.gmra.mxu1 %vm196_vm2, %v2370_v6 }
0x1a8d   :  { %3534 = vmatpush3.bf16.xpose.msra.mxu1 %v2480_v9  ;;  %v2319_v10 = vpop.f32.mrf.mxu1  ;;  %3535 = vmatprep.mubr.msk.bf16.mxu1 %vm3736_vm1, %v3735_v15 }
0x1a8e   :  { %3545 = vmatprep.subr.bf16.mxu1 %v3735_v15 }
0x1a8f   :  { %v3514_v17 = vpop.f32.mrf.mxu1 }
0x1a94   :  { %3536 = vmatmul.mubr.msk.bf16.vlgmr.msra.gmra.mxu1 %vm196_vm2, %v2473_v38 }
0x1a95   :  { %3547 = vmatprep.mubr.msk.bf16.mxu1 %vm3736_vm1, %v3735_v15 }
0x1b0c   :  { %v2524_v12 = vpop.xlane.xlu0 %2523 }
0x1b0d   :  { %v2528_v13 = vsub.f32 %v2467_v1, %v2524_v12  ;;  %v3139_v1 = vld [vmem:[%s4480_s7 + $0x1] ss:$0 sm:$0xff] }
0x1b0f   :  { %v2530_v14 = vmul.f32 1.442695, %v2528_v13 }
0x1b11   :  { %3689 = vpow2.f32 %v2530_v14 }
0x1b1e   :  { %v3690_v16 = vpop.eup %3689 }
0x1b1f   :  { %v2534_v18 = vsel %vm196_vm2, %v3690_v16, 0.0 }
0x1b20   :  { %2535 = vadd.xlane.f32.xlu0 %v2534_v18 }
0x1b4c   :  { %v2413_v21 = vpop.f32.mrf.mxu1 }
0x1b4d   :  { %v2420_v24 = vadd.f32 %v2413_v21, %v2144_v19 }
0x1b4e   :  { %v3525_v25 = vpop.f32.mrf.mxu1 }
0x1b4f   :  { %v3610_v25 = vld [vmem:[%s4483_s10 + $0x10] sm:$0xff]  }
0x1b50   :  { %v2416_v27 = vpop.f32.mrf.mxu1 }
0x1b51   :  { %v2421_v28 = vadd.f32 %v2416_v27, %v2147_v26 }
0x1b52   :  { %v3526_v29 = vpop.f32.mrf.mxu1 }
0x1b54   :  { %v2516_v33 = vpop.f32.mrf.mxu1 }
0x1b55   :  { %v2517_v34 = vadd.f32 %v4214_v23, %v2516_v33 }
0x1b56   :  { %v3537_v36 = vpop.f32.mrf.mxu1 }
0x1b57   :  { %v2525_v37 = vsel %vm196_vm2, %v2517_v34, -inf }
0x1b58   :  { %2526 = vmax.xlane.f32.xlu1 %v2525_v37  ;;  %v2519_v39 = vpop.f32.mrf.mxu1 }
0x1b59   :  { %v3142_v39 = vld [vmem:[%s4481_s8 + $0x1] ss:$0 sm:$0xff] }
0x1b5a   :  { %v3538_v40 = vpop.f32.mrf.mxu1 }
0x1b69   :  { %2594 = vrot.lane.b32.xlu1 %v4188_v11, %s4508_s26 }
0x1ba9   :  { %v2536_v43 = vpop.xlane.xlu0 %2535 }
0x1be1   :  { %v2527_v3 = vpop.xlane.xlu1 %2526 }
0x1be2   :  { %v2529_v20 = vsub.f32 %v2517_v34, %v2527_v3 }
0x1be4   :  { %v2532_v41 = vmul.f32 1.442695, %v2529_v20 }
0x1be5   :  { %v2595_v47 = vpop.permute.xlu1 %2594 }
0x1be6   :  { %3691 = vpow2.f32 %v2532_v41  ;;  %v2600_v5 = vsel %vm321_vm3, %v2595_v47, 0  ;;  %v3143_v41 = vld [vmem:[%s4482_s9 + $0x1] ss:$0 sm:$0xff] }
0x1be7   :  { %3546 = vmatpush3.bf16.msra.mxu1 %v2600_v5  ;;  %3693 = vrcp.f32 %v2536_v43  ;;  %v3611_v43 = vld [vmem:[%s4485_s12 + $0x38] sm:$0xff]  }
0x1be8   :  { %3557 = vmatprep.subr.bf16.mxu1 %v3735_v15 }
0x1bf3   :  { %v3692_v23 = vpop.eup %3691 }
0x1bf4   :  { %v2537_v22 = vsel %vm196_vm2, %v3692_v23, 0.0  ;;  %v3694_v11 = vpop.eup %3693 }
0x1bf5   :  { %2538 = vadd.xlane.f32.xlu0 %v2537_v22  ;;  %v2542_v45 = vmul.f32 %v3694_v11, %v3690_v16  ;;  %v3612_v11 = vld [vmem:[%s4485_s12 + $0x30] sm:$0xff]  }
0x1bf7   :  { %v2544_v49 = vpack.c.bf16 %v2542_v45, %v2542_v45  ;;  %v3614_v45 = vld [vmem:[%s4485_s12 + $0x20] sm:$0xff]  }
0x1c0b   :  { %2546 = vrot.lane.b32.xlu0 %v4184_v7, %s4508_s26 }
0x1c7e   :  { %v2539_v44 = vpop.xlane.xlu0 %2538 }
0x1c7f   :  { %3695 = vrcp.f32 %v2539_v44  ;;  %v3613_v44 = vld [vmem:[%s4485_s12 + $0x28] sm:$0xff]  }
0x1c82   :  { %v2547_v46 = vpop.permute.xlu0 %2546 }
0x1c83   :  { %v2552_v48 = vsel %vm321_vm3, %v2547_v46, 0  ;;  %v3149_v46 = vld [vmem:[%s4484_s11 + $0x1] ss:$0 sm:$0xff] }
0x1c84   :  { %3540 = vmatpush3.bf16.msra.mxu0 %v2552_v48 }
0x1c85   :  { %3551 = vmatprep.subr.bf16.mxu0 %v3735_v15 }
0x1c87   :  { %3542 = vmatmul.mubr.msk.bf16.vlgmr.msra.gmra.mxu0 %vm196_vm2, %v2544_v49 }
0x1c88   :  { %3553 = vmatprep.mubr.msk.bf16.mxu0 %vm3736_vm1, %v3735_v15  ;;  %3552 = vmatpush3.bf16.msra.mxu0 %v2649_v55 }
0x1c89   :  { %3565 = vmatprep.subr.bf16.mxu0 %v3735_v15 }
0x1c8c   :  { %v3696_v50 = vpop.eup %3695 }
0x1c8d   :  { %v2543_v7 = vmul.f32 %v3696_v50, %v3692_v23 }
0x1c8f   :  { %v2545_v53 = vpack.c.bf16 %v2543_v7, %v2543_v7 }
0x1c91   :  { %3548 = vmatmul.mubr.msk.bf16.vlgmr.msra.gmra.mxu1 %vm196_vm2, %v2545_v53 }
0x1c92   :  { %3561 = vmatprep.mubr.msk.bf16.mxu1 %vm3736_vm1, %v3735_v15 }
0x1d47   :  { %v2588_v32 = vpop.f32.mrf.mxu0 }
0x1d49   :  { %v3543_v56 = vpop.f32.mrf.mxu0 }
0x1d4b   :  { %v2591_v57 = vpop.f32.mrf.mxu0 }
0x1d4d   :  { %v3544_v58 = vpop.f32.mrf.mxu0 }
0x1d51   :  { %v2636_v59 = vpop.f32.mrf.mxu1 }
0x1d52   :  { %v2642_v60 = vpack.c.bf16 %v2636_v59, %v2588_v32 }
0x1d53   :  { %v3549_v61 = vpop.f32.mrf.mxu1 }
0x1d54   :  { %3554 = vmatmul.mubr.msk.bf16.vlgmr.msra.gmra.mxu0 %vm196_vm2, %v2642_v60 }
0x1d55   :  { %v2639_v62 = vpop.f32.mrf.mxu1  ;;  %3573 = vmatprep.mubr.msk.bf16.mxu0 %vm3736_vm1, %v3735_v15  ;;  %3566 = vmatpush3.bf16.msra.mxu0 %v3611_v43 }
0x1d56   :  { %3567 = vmatprep.subr.bf16.mxu0 %v3735_v15 }
0x1d57   :  { %v3550_v63 = vpop.f32.mrf.mxu1 }
0x1d59   :  { %3568 = vmatpush3.bf16.msra.mxu0 %v3612_v11 }
0x1d5a   :  { %3569 = vmatprep.subr.bf16.mxu0 %v3735_v15 }
0x1d5d   :  { %3570 = vmatpush3.bf16.msra.mxu0 %v3613_v44 }
0x1d5e   :  { %3571 = vmatprep.subr.bf16.mxu0 %v3735_v15 }
0x1d61   :  { %3572 = vmatpush3.bf16.msra.mxu0 %v3614_v45 }
0x1e14   :  { %v2685_v0 = vpop.f32.mrf.mxu0 }
0x1e15   :  { %v2692_v2 = vadd.f32 %v2685_v0, %v2420_v24 }
0x1e16   :  { %v3555_v30 = vpop.f32.mrf.mxu0 }
0x1e17   :  { %v2702_v52 = vadd.f32 %v3139_v1, %v2692_v2 }
0x1e18   :  { %v2688_v51 = vpop.f32.mrf.mxu0 }
0x1e19   :  { %v2693_v4 = vadd.f32 %v2688_v51, %v2421_v28  ;;  %v2704_v42 = vadd.f32 %v2702_v52, %v4172_v35 }
0x1e1a   :  { %v3556_v6 = vpop.f32.mrf.mxu0 }
0x1e1b   :  { %v2703_v8 = vadd.f32 %v3139_v1, %v2693_v4  ;;  %v2710_v9 = vsel %vm67_vm0, %v2704_v42, 0.0  ;;  %v3162_v1 = vld [vmem:[%s4486_s13 + $0x1] ss:$0 sm:$0xff] }
0x1e1c   :  { %2711 = vadd.xlane.f32.xlu1 %v2710_v9 }
0x1e1d   :  { %v2705_v10 = vadd.f32 %v2703_v8, %v4174_v54  ;;  %v3609_v54 = vld [vmem:[%s4483_s10 + $0x18] sm:$0xff]  }
0x1e1e   :  { %3558 = vmatpush3.bf16.msra.mxu1 %v3609_v54  ;;  %v3616_v54 = vld [vmem:[%s4489_s16] sm:$0xff]  }
0x1e1f   :  { %v2713_v17 = vsel %vm67_vm0, %v2705_v10, 0.0  ;;  %3559 = vmatprep.subr.bf16.mxu1 %v3735_v15 }
0x1e20   :  { %2714 = vadd.xlane.f32.xlu0 %v2713_v17 }
0x1e22   :  { %3560 = vmatpush3.bf16.msra.mxu1 %v3610_v25 }
0x1e23   :  { %3577 = vmatprep.subr.bf16.mxu1 %v3735_v15 }
0x1ea5   :  { %v2712_v38 = vpop.xlane.xlu1 %2711 }
0x1ea6   :  { %v2716_v12 = vmul.f32 0.03125, %v2712_v38 }
0x1ea8   :  { %v2718_v13 = vsub.f32 %v2704_v42, %v2716_v12 }
0x1ea9   :  { %v2715_v14 = vpop.xlane.xlu0 %2714 }
0x1eaa   :  { %v2717_v16 = vmul.f32 0.03125, %v2715_v14  ;;  %v2720_v18 = vmul.f32 %v2718_v13, %v2718_v13 }
0x1eac   :  { %v2719_v19 = vsub.f32 %v2705_v10, %v2717_v16  ;;  %v2722_v21 = vsel %vm67_vm0, %v2720_v18, 0.0 }
0x1ead   :  { %2723 = vadd.xlane.f32.xlu0 %v2722_v21 }
0x1eae   :  { %v2721_v35 = vmul.f32 %v2719_v19, %v2719_v19 }
0x1eb0   :  { %v2725_v24 = vsel %vm67_vm0, %v2721_v35, 0.0 }
0x1eb1   :  { %2726 = vadd.xlane.f32.xlu1 %v2725_v24  ;;  %v3615_v24 = vld [vmem:[%s4489_s16 + $0x8] sm:$0xff]  }
0x1f36   :  { %v2724_v26 = vpop.xlane.xlu0 %2723 }
0x1f37   :  { %v2728_v27 = vmul.f32 0.03125, %v2724_v26 }
0x1f39   :  { %v2730_v28 = vadd.f32 1e-05, %v2728_v27 }
0x1f3a   :  { %v2727_v29 = vpop.xlane.xlu1 %2726 }
0x1f3b   :  { %3697 = vrsqrt.f32 %v2730_v28  ;;  %v2729_v33 = vmul.f32 0.03125, %v2727_v29 }
0x1f3d   :  { %v2731_v34 = vadd.f32 1e-05, %v2729_v33 }
0x1f3f   :  { %3699 = vrsqrt.f32 %v2731_v34 }
0x1f48   :  { %v3698_v36 = vpop.eup %3697 }
0x1f49   :  { %v2734_v37 = vmul.f32 %v3698_v36, %v2718_v13  ;;  %v3170_v36 = vld [vmem:[%s4487_s14 + $0x1] ss:$0 sm:$0xff] }
0x1f4b   :  { %v2742_v20 = vmul.f32 %v3142_v39, %v2734_v37 }
0x1f4c   :  { %v3700_v40 = vpop.eup %3699 }
0x1f4d   :  { %v2735_v3 = vmul.f32 %v3700_v40, %v2719_v19  ;;  %v2750_v5 = vadd.f32 %v3143_v41, %v2742_v20 }
0x1f4f   :  { %v2743_v47 = vmul.f32 %v3142_v39, %v2735_v3 }
0x1f51   :  { %v2751_v23 = vadd.f32 %v3143_v41, %v2743_v47 }
0x1f53   :  { %v2757_v22 = vpack.c.bf16 %v2751_v23, %v2750_v5 }
0x1f55   :  { %3562 = vmatmul.mubr.msk.bf16.vlgmr.msra.gmra.mxu1 %vm67_vm0, %v2757_v22 }
0x1f56   :  { %3581 = vmatprep.mubr.msk.bf16.mxu1 %vm3736_vm1, %v3735_v15  ;;  %3578 = vmatpush3.bf16.msra.mxu1 %v3615_v24 }
0x1f57   :  { %3579 = vmatprep.subr.bf16.mxu1 %v3735_v15  ;;  %v3171_v15 = vld [vmem:[%s4488_s15 + $0x1] ss:$0 sm:$0xff]  ;;  %s3748_s15 = smov [#allocation2]  }
0x1f58   :  { %s3051_s24 = sshll.u32 %s3748_s15, 4  ;;  %s3052_s24 = int_to_ptr.vmem [resolvable:$true] %s3051_s24 }
0x1f59   :  { %s3713_s5 = scalar_lea.vmem %s3052_s24, 32  ;;  %p3718_p1 = scmp.lt.s32.totalorder %s3052_s24, %s3052_s24 }
0x1f5a   :  { %3580 = vmatpush3.bf16.msra.mxu1 %v3616_v54  ;;  %p3714_p0 = scmp.ne.s32.totalorder %s3052_s24, %s3713_s5  ;;  %p3719_p2 = scmp.lt.s32.totalorder %s3713_s5, %s3713_s5 }
0x1f5c   :  { %p3720_p3 = por %p3719_p2, %p3718_p1 }
0x1f5e   :  { %p3721_p4 = pnand %p3720_p3, %p3714_p0 }
0x2015   :  { %v2815_v48 = vpop.f32.mrf.mxu1 }
0x2016   :  { %v2816_v49 = vadd.f32 %v3149_v46, %v2815_v48 }
0x2017   :  { %v3563_v50 = vpop.f32.mrf.mxu1 }
0x2018   :  { %v2824_v7 = vmul.f32 0.70710677, %v2816_v49  ;;  %v2822_v59 = vmul.f32 0.5, %v2816_v49 }
0x2019   :  { %v2818_v53 = vpop.f32.mrf.mxu1 }
0x201a   :  { %3701 = verf.f32 %v2824_v7  ;;  %v2819_v31 = vadd.f32 %v3149_v46, %v2818_v53  ;;  %v3172_v46 = vld [vmem:[%s4490_s17] ss:$0 sm:$0xff] }
0x201b   :  { %v3564_v55 = vpop.f32.mrf.mxu1 }
0x201c   :  { %v2825_v32 = vmul.f32 0.70710677, %v2819_v31  ;;  %v2823_v60 = vmul.f32 0.5, %v2819_v31 }
0x201e   :  { %3703 = verf.f32 %v2825_v32 }
0x2027   :  { %v3702_v56 = vpop.eup %3701 }
0x2028   :  { %v2828_v57 = vadd.f32 1.0, %v3702_v56 }
0x202a   :  { %v2830_v62 = vmul.f32 %v2828_v57, %v2822_v59 }
0x202b   :  { %v3704_v58 = vpop.eup %3703 }
0x202c   :  { %v2829_v61 = vadd.f32 1.0, %v3704_v58 }
0x202e   :  { %v2831_v63 = vmul.f32 %v2829_v61, %v2823_v60 }
0x2030   :  { %v2841_v0 = vpack.c.bf16 %v2831_v63, %v2830_v62 }
0x2032   :  { %3574 = vmatmul.mubr.msk.bf16.vlgmr.msra.gmra.mxu0 %vm1449_vm4, %v2841_v0 }
0x20f2   :  { %v2911_v2 = vpop.f32.mrf.mxu0 }
0x20f3   :  { %v2912_v30 = vadd.f32 %v3162_v1, %v2911_v2 }
0x20f4   :  { %v3575_v52 = vpop.f32.mrf.mxu0 }
0x20f5   :  { %v2918_v51 = vadd.f32 %v2912_v30, %v2750_v5 }
0x20f6   :  { %v2914_v4 = vpop.f32.mrf.mxu0 }
0x20f7   :  { %v2915_v42 = vadd.f32 %v3162_v1, %v2914_v4  ;;  %v2924_v6 = vsel %vm67_vm0, %v2918_v51, 0.0 }
0x20f8   :  { %2925 = vadd.xlane.f32.xlu1 %v2924_v6  ;;  %v3576_v8 = vpop.f32.mrf.mxu0 }
0x20f9   :  { %v2919_v9 = vadd.f32 %v2915_v42, %v2751_v23 }
0x20fb   :  { %v2927_v10 = vsel %vm67_vm0, %v2919_v9, 0.0 }
0x20fc   :  { %2928 = vadd.xlane.f32.xlu0 %v2927_v10 }
0x2181   :  { %v2926_v17 = vpop.xlane.xlu1 %2925 }
0x2182   :  { %v2930_v38 = vmul.f32 0.03125, %v2926_v17 }
0x2184   :  { %v2932_v12 = vsub.f32 %v2918_v51, %v2930_v38 }
0x2185   :  { %v2929_v13 = vpop.xlane.xlu0 %2928 }
0x2186   :  { %v2931_v14 = vmul.f32 0.03125, %v2929_v13  ;;  %v2934_v16 = vmul.f32 %v2932_v12, %v2932_v12 }
0x2188   :  { %v2933_v18 = vsub.f32 %v2919_v9, %v2931_v14  ;;  %v2936_v19 = vsel %vm67_vm0, %v2934_v16, 0.0 }
0x2189   :  { %2937 = vadd.xlane.f32.xlu1 %v2936_v19 }
0x218a   :  { %v2935_v21 = vmul.f32 %v2933_v18, %v2933_v18 }
0x218c   :  { %v2939_v35 = vsel %vm67_vm0, %v2935_v21, 0.0 }
0x218d   :  { %2940 = vadd.xlane.f32.xlu0 %v2939_v35 }
0x2212   :  { %v2938_v25 = vpop.xlane.xlu1 %2937 }
0x2213   :  { %v2942_v26 = vmul.f32 0.03125, %v2938_v25 }
0x2215   :  { %v2944_v27 = vadd.f32 1e-05, %v2942_v26 }
0x2216   :  { %v2941_v28 = vpop.xlane.xlu0 %2940 }
0x2217   :  { %3705 = vrsqrt.f32 %v2944_v27  ;;  %v2943_v29 = vmul.f32 0.03125, %v2941_v28 }
0x2219   :  { %v2945_v33 = vadd.f32 1e-05, %v2943_v29 }
0x221b   :  { %3707 = vrsqrt.f32 %v2945_v33 }
0x2224   :  { %v3706_v34 = vpop.eup %3705 }
0x2225   :  { %v2948_v37 = vmul.f32 %v3706_v34, %v2932_v12 }
0x2227   :  { %v2956_v39 = vmul.f32 %v3170_v36, %v2948_v37 }
0x2228   :  { %v3708_v40 = vpop.eup %3707 }
0x2229   :  { %v2949_v3 = vmul.f32 %v3708_v40, %v2933_v18  ;;  %v2964_v41 = vadd.f32 %v3171_v15, %v2956_v39 }
0x222b   :  { %v2957_v20 = vmul.f32 %v3170_v36, %v2949_v3  ;;  %v2970_v5 = vpack.c.bf16 %v2964_v41, %v2964_v41 }
0x222d   :  { %v2965_v47 = vadd.f32 %v3171_v15, %v2957_v20  ;;  %v2981_v43 = vunpack.c.l.b16 %v2970_v5 }
0x222f   :  { %v2971_v23 = vpack.c.bf16 %v2965_v47, %v2965_v47 }
0x2231   :  { %v2982_v22 = vunpack.c.l.b16 %v2971_v23 }
0x2233   :  { %v2983_v11 = vrot.slane %v2982_v22, 7 }
0x2235   :  { %v2985_v44 = vsel %vm2984_vm5, %v2983_v11, %v2981_v43 }
0x2236   :  { %v2986_v45 = vpack.c.b16 %v2985_v44, %v2985_v44 }
0x2238   :  { %3582 = vmatmul.mubr.msk.bf16.vlgmr.msra.gmra.mxu1 %vm67_vm0, %v2986_v45 }
0x22f8   :  { %v3036_v48 = vpop.f32.mrf.mxu1 }
0x22f9   :  { %v3037_v49 = vadd.f32 %v3172_v46, %v3036_v48 }
0x22fa   :  { %v3583_v50 = vpop.f32.mrf.mxu1 }
0x22fb   :  { %3709 = vtanh.f32 %v3037_v49 }
0x22fc   :  { %v3039_v7 = vpop.f32.mrf.mxu1 }
0x22fe   :  { %v3584_v53 = vpop.f32.mrf.mxu1 }
0x2308   :  { %v3710_v31 = vpop.eup %3709 }
0x2309   :  { %3044 = vst.msk [vmem:[#allocation2] sm:$0x3] %vm3043_vm6, %v3710_v31 }
0x230a   :  { %3724 = shalt.err (!%p3721_p4)
}
0x230b   :  { %3054 = dma.vmem_to_hbm [thread:$0]  %s3052_s24, 32, %s4491_s18, [#allocation3]  }
0x230c   :  { %3733 = dma.done.wait [#allocation3], 32  }
0x230d   :  { %3734 = vsyncadd [#allocation3], 4294967264 }
0x230e   :  { %3058 = vsyncpa [#allocation3], 1 }

</bundles_post_ra>
